<compile_context>
chip_gen: v7x
topology: tpu7x:2x2x1
jax: 0.10.0
libtpu: 0.0.40
codegen_flags: <defaults>
</compile_context>

<pallas_src>
import math

import jax
import jax.numpy as jnp
from jax.experimental import pallas as pl
from jax.experimental.pallas import tpu as pltpu


def _round_up(x, m):
    return ((x + m - 1) // m) * m


_SQRT_2_OVER_PI = math.sqrt(2.0 / math.pi)


def _gelu(x):
    # tanh-form GELU (EUP-routed tanh); ~1e-3 max deviation from exact-erf GELU.
    return 0.5 * x * (1.0 + jnp.tanh(_SQRT_2_OVER_PI * (x + 0.044715 * x * x * x)))


def _layer_norm(x, gamma, beta, eps):
    mean = jnp.mean(x, axis=-1, keepdims=True)
    var = jnp.mean((x - mean) ** 2, axis=-1, keepdims=True)
    return (x - mean) * jax.lax.rsqrt(var + eps) * gamma + beta


def _softmax_attn(x):
    # attention softmax: approx reciprocal (EUP slot) on the large denominator
    m = jnp.max(x, axis=-1, keepdims=True)
    e = jnp.exp(x - m)
    d = jnp.sum(e, axis=-1, keepdims=True)
    return e * pl.reciprocal(d, approx=True)


def _softmax_exact(x):
    # MoE gate softmax: exact divide (tiny tensor; expert mixing weights exact)
    m = jnp.max(x, axis=-1, keepdims=True)
    e = jnp.exp(x - m)
    return e / jnp.sum(e, axis=-1, keepdims=True)


def _param_order(n_experts):
    names = ["wqkv", "bqkv", "wo", "bo", "ln1_g", "ln1_b",
             "w1", "b1", "w2", "b2"]
    if n_experts > 1:
        names += ["wg", "bg"]
    names += ["ln2_g", "ln2_b"]
    return names


def _make_encoder_kernel(expert_counts, emit_layers, n_heads, layer_norm_eps,
                         S, H, Hp, inner):
    n_out = len(emit_layers)
    emit_set = set(emit_layers)
    dh = H // n_heads

    def kernel(*refs):
        x_ref, mask_ref = refs[0], refs[1]
        out_refs = refs[len(refs) - n_out:]
        params = list(refs[2:len(refs) - n_out])

        idx = [0]

        def take():
            r = params[idx[0]]
            idx[0] += 1
            return r

        hs = x_ref[0]               # (S, H) f32, stays VMEM-resident across layers
        mask = mask_ref[0]          # (S, S) additive attention mask, f32

        out_idx = 0
        for li, E in enumerate(expert_counts):
            wqkv = take(); bqkv = take(); wo = take(); bo = take()
            ln1_g = take(); ln1_b = take()
            w1 = take(); b1 = take(); w2 = take(); b2 = take()
            if E > 1:
                wg = take(); bg = take()
            ln2_g = take(); ln2_b = take()

            # ---------------- multi-head self attention ----------------
            hs_b = hs.astype(jnp.bfloat16)
            # fused QKV projection; 1/sqrt(dh) already folded into Q weight+bias
            qkv = jnp.dot(hs_b, wqkv[...],
                          preferred_element_type=jnp.float32) + bqkv[0]  # (S, 3*Hp)

            def split_heads(base):
                # lane-aligned per-head slices, stacked on a new LEADING axis
                return jnp.stack(
                    [qkv[:, base + h * dh: base + (h + 1) * dh]
                     for h in range(n_heads)], axis=0).astype(jnp.bfloat16)

            q = split_heads(0)            # (nh, S, dh)
            k = split_heads(Hp)
            v = split_heads(2 * Hp)

            # single batched-over-heads matmuls (no per-head matmul loop)
            s = jnp.einsum('hqd,hkd->hqk', q, k,
                           preferred_element_type=jnp.float32) + mask[None]
            p = _softmax_attn(s)                       # attn dropout: identity (eval)
            ctx3 = jnp.einsum('hqk,hkd->hqd', p.astype(jnp.bfloat16), v,
                              preferred_element_type=jnp.float32)        # (nh, S, dh)
            ctx = (jnp.concatenate([ctx3[h] for h in range(n_heads)], axis=-1)
                   if n_heads > 1 else ctx3[0])                           # (S, H)

            attn_pre = jnp.dot(ctx.astype(jnp.bfloat16), wo[...],
                               preferred_element_type=jnp.float32) + bo[0]
            attn = _layer_norm(attn_pre + hs, ln1_g[0], ln1_b[0], layer_norm_eps)

            # ---------------- feed forward (E experts fused) -------------
            attn_b = attn.astype(jnp.bfloat16)
            h1 = jnp.dot(attn_b, w1[...],
                         preferred_element_type=jnp.float32) + b1[0]      # (S, E*inner)
            h1 = _gelu(h1)                              # hidden dropout: identity (eval)

            if E > 1:
                glog = jnp.dot(attn_b, wg[...],
                               preferred_element_type=jnp.float32) + bg[0]  # (S, E)
                gate = _softmax_exact(glog)
                # fold gate into the lane-aligned per-expert slices of h1,
                # fused into the bf16 cast feeding the single W2 matmul.
                h1g = jnp.concatenate(
                    [h1[:, e * inner:(e + 1) * inner] * gate[:, e:e + 1]
                     for e in range(E)], axis=-1).astype(jnp.bfloat16)
                ffn = jnp.dot(h1g, w2[...], preferred_element_type=jnp.float32)
                # gate-weighted expert biases: small VPU weighted sum
                bias = gate[:, 0:1] * b2[0]
                for e in range(1, E):
                    bias = bias + gate[:, e:e + 1] * b2[e]
                ffn = ffn + bias
            else:
                ffn = jnp.dot(h1.astype(jnp.bfloat16), w2[...],
                              preferred_element_type=jnp.float32) + b2[0]

            out = _layer_norm(ffn + attn, ln2_g[0], ln2_b[0], layer_norm_eps)
            if li in emit_set:
                out_refs[out_idx][...] = out[None].astype(out_refs[out_idx].dtype)
                out_idx += 1
            hs = out

    return kernel


def _vmem_limit_bytes(S, H, Hp, inner, expert_counts, n_heads, flat_params, n_out):
    f32 = 4
    weight_bytes = sum(int(p.size) * p.dtype.itemsize for p in flat_params)
    max_e = max(expert_counts)
    act = (4 * S * H + S * 3 * Hp + 3 * n_heads * S * S
           + 4 * S * max_e * inner) * f32
    io = 2 * (S * H + S * S + n_out * S * H) * f32          # double-buffered blocks
    est = 2 * weight_bytes + act + io + (2 << 20)
    try:
        cap = pltpu.get_tpu_info().vmem_capacity_bytes
    except Exception:
        cap = 64 * 1024 * 1024                               # v7x per-core physical
    return int(min(max(est, 16 * 1024 * 1024), int(0.75 * cap)))


def run_transformer_encoder(x, mask, layer_params, expert_counts, *,
                            n_heads, layer_norm_eps, inner_size,
                            output_all_encoded_layers=True):
    B, S, H = x.shape
    Hp = _round_up(H, 128)
    x = x.astype(jnp.float32)                 # keep full input precision
    mask = mask.astype(jnp.float32)

    n_layers = len(expert_counts)
    emit_layers = (tuple(range(n_layers)) if output_all_encoded_layers
                   else (n_layers - 1,))

    flat_params = []
    for p, E in zip(layer_params, expert_counts):
        flat_params += [p[name] for name in _param_order(E)]

    kernel = _make_encoder_kernel(tuple(expert_counts), emit_layers, n_heads,
                                  layer_norm_eps, S, H, Hp, inner_size)

    # grid over batch: "parallel" -> megacore sharding; weights get constant
    # index_maps so they are DMA'd once and stay resident across all steps.
    in_specs = [pl.BlockSpec((1, S, H), lambda b: (b, 0, 0)),
                pl.BlockSpec((1, S, S), lambda b: (b, 0, 0))]
    for prm in flat_params:
        in_specs.append(pl.BlockSpec(prm.shape, lambda b: (0, 0)))

    out_specs = tuple(pl.BlockSpec((1, S, H), lambda b: (b, 0, 0))
                      for _ in emit_layers)
    out_shapes = tuple(jax.ShapeDtypeStruct((B, S, H), jnp.float32)
                       for _ in emit_layers)

    vmem_limit = _vmem_limit_bytes(S, H, Hp, inner_size, expert_counts,
                                   n_heads, flat_params, len(emit_layers))

    outs = pl.pallas_call(
        kernel,
        grid=(B,),
        in_specs=in_specs,
        out_specs=out_specs,
        out_shape=out_shapes,
        compiler_params=pltpu.CompilerParams(
            dimension_semantics=("parallel",),
            vmem_limit_bytes=vmem_limit),
    )(x, mask, *flat_params)
    return list(outs)


def transformer_encoder(x, mask, layer_params, expert_counts, *, n_heads,
                        layer_norm_eps, inner_size, output_all_encoded_layers=True):
    return run_transformer_encoder(
        x, mask, layer_params, expert_counts,
        n_heads=n_heads, layer_norm_eps=layer_norm_eps, inner_size=inner_size,
        output_all_encoded_layers=output_all_encoded_layers)


def init_layer_params(key, hidden, inner, n_exps, n_heads):
    ks = jax.random.split(key, 8)
    Hp = _round_up(hidden, 128)
    dh = hidden // n_heads
    scale = 1.0 / math.sqrt(dh)

    def lin(k, fan_in, fan_out):
        kw, kb = jax.random.split(k)
        w = jax.random.normal(kw, (fan_in, fan_out), jnp.float32) * 0.02
        b = jax.random.normal(kb, (1, fan_out), jnp.float32) * 0.02
        return w, b

    wq, bq = lin(ks[0], hidden, hidden)
    wk, bk = lin(ks[1], hidden, hidden)
    wv, bv = lin(ks[2], hidden, hidden)
    wo, bo = lin(ks[3], hidden, hidden)

    # fold the 1/sqrt(dh) attention scale into the Q projection (weight + bias)
    wq = wq * scale
    bq = bq * scale

    # fused QKV weight; Q/K/V each padded to a 128-lane boundary (Hp) so the
    # in-kernel slices are lane-aligned views.
    wqkv = jnp.zeros((hidden, 3 * Hp), jnp.float32)
    wqkv = wqkv.at[:, 0:hidden].set(wq)
    wqkv = wqkv.at[:, Hp:Hp + hidden].set(wk)
    wqkv = wqkv.at[:, 2 * Hp:2 * Hp + hidden].set(wv)
    bqkv = jnp.zeros((1, 3 * Hp), jnp.float32)
    bqkv = bqkv.at[:, 0:hidden].set(bq)
    bqkv = bqkv.at[:, Hp:Hp + hidden].set(bk)
    bqkv = bqkv.at[:, 2 * Hp:2 * Hp + hidden].set(bv)

    E = n_exps
    w1s, b1s, w2s, b2s = [], [], [], []
    ek = jax.random.split(ks[4], E)
    for e in range(E):
        k1, k2 = jax.random.split(ek[e])
        w1e, b1e = lin(k1, hidden, inner)
        w2e, b2e = lin(k2, inner, hidden)
        w1s.append(w1e); b1s.append(b1e); w2s.append(w2e); b2s.append(b2e)

    p = {
        "wqkv": wqkv.astype(jnp.bfloat16),          # MXU weights in bf16
        "bqkv": bqkv,                               # biases / LN params stay f32
        "wo": wo.astype(jnp.bfloat16),
        "bo": bo,
        "ln1_g": jnp.ones((1, hidden), jnp.float32),
        "ln1_b": jnp.zeros((1, hidden), jnp.float32),
        "w1": jnp.concatenate(w1s, axis=1).astype(jnp.bfloat16),   # (H, E*inner)
        "b1": jnp.concatenate(b1s, axis=1),                        # (1, E*inner)
        "w2": jnp.concatenate(w2s, axis=0).astype(jnp.bfloat16),   # (E*inner, H)
        "b2": jnp.concatenate(b2s, axis=0),                        # (E, H)
        "ln2_g": jnp.ones((1, hidden), jnp.float32),
        "ln2_b": jnp.zeros((1, hidden), jnp.float32),
    }
    if E > 1:
        p["wg"] = (jax.random.normal(ks[5], (hidden, E), jnp.float32) * 0.02
                   ).astype(jnp.bfloat16)
        p["bg"] = jnp.zeros((1, E), jnp.float32)
    return p


if __name__ == "__main__":
    # shapes consistent with the module defaults (kept small)
    B, S = 2, 8
    hidden_size, inner_size = 64, 256
    n_layers, n_heads, last_n_MoE, n_exps = 2, 2, 1, 4
    layer_norm_eps = 1e-12

    key = jax.random.PRNGKey(0)
    k_x, k_p = jax.random.split(key)
    x = jax.random.normal(k_x, (B, S, hidden_size), jnp.float32)

    # additive attention mask: causal (0 keep / -10000 masked), per-batch
    causal = jnp.tril(jnp.ones((S, S), jnp.float32))
    attention_mask = jnp.broadcast_to((1.0 - causal) * -10000.0, (B, S, S))

    layer_keys = jax.random.split(k_p, n_layers)
    layer_params, expert_counts = [], []
    for i in range(n_layers):
        E = n_exps if (i + last_n_MoE) >= n_layers else 1
        expert_counts.append(E)
        layer_params.append(init_layer_params(layer_keys[i], hidden_size,
                                              inner_size, E, n_heads))

    outs = transformer_encoder(x, attention_mask, layer_params, expert_counts,
                               n_heads=n_heads, layer_norm_eps=layer_norm_eps,
                               inner_size=inner_size,
                               output_all_encoded_layers=True)
    for o in outs:
        jax.block_until_ready(o)
    assert len(outs) == n_layers
    assert all(o.shape == (B, S, hidden_size) for o in outs)
    assert all(bool(jnp.all(jnp.isfinite(o))) for o in outs)
    print("KERNEL_OK")
</pallas_src>

<mosaic_0001>
module attributes {stable_mosaic.version = 11 : i64} {
  func.func @kernel(%arg0: i32, %arg1: memref<1x8x64xf32, #tpu.memory_space<vmem>>, %arg2: memref<1x8x8xf32, #tpu.memory_space<vmem>>, %arg3: memref<64x384xbf16, #tpu.memory_space<vmem>>, %arg4: memref<1x384xf32, #tpu.memory_space<vmem>>, %arg5: memref<64x64xbf16, #tpu.memory_space<vmem>>, %arg6: memref<1x64xf32, #tpu.memory_space<vmem>>, %arg7: memref<1x64xf32, #tpu.memory_space<vmem>>, %arg8: memref<1x64xf32, #tpu.memory_space<vmem>>, %arg9: memref<64x256xbf16, #tpu.memory_space<vmem>>, %arg10: memref<1x256xf32, #tpu.memory_space<vmem>>, %arg11: memref<256x64xbf16, #tpu.memory_space<vmem>>, %arg12: memref<1x64xf32, #tpu.memory_space<vmem>>, %arg13: memref<1x64xf32, #tpu.memory_space<vmem>>, %arg14: memref<1x64xf32, #tpu.memory_space<vmem>>, %arg15: memref<64x384xbf16, #tpu.memory_space<vmem>>, %arg16: memref<1x384xf32, #tpu.memory_space<vmem>>, %arg17: memref<64x64xbf16, #tpu.memory_space<vmem>>, %arg18: memref<1x64xf32, #tpu.memory_space<vmem>>, %arg19: memref<1x64xf32, #tpu.memory_space<vmem>>, %arg20: memref<1x64xf32, #tpu.memory_space<vmem>>, %arg21: memref<64x1024xbf16, #tpu.memory_space<vmem>>, %arg22: memref<1x1024xf32, #tpu.memory_space<vmem>>, %arg23: memref<1024x64xbf16, #tpu.memory_space<vmem>>, %arg24: memref<4x64xf32, #tpu.memory_space<vmem>>, %arg25: memref<64x4xbf16, #tpu.memory_space<vmem>>, %arg26: memref<1x4xf32, #tpu.memory_space<vmem>>, %arg27: memref<1x64xf32, #tpu.memory_space<vmem>>, %arg28: memref<1x64xf32, #tpu.memory_space<vmem>>, %arg29: memref<1x8x64xf32, #tpu.memory_space<vmem>>, %arg30: memref<1x8x64xf32, #tpu.memory_space<vmem>>) attributes {dimension_semantics = [#tpu.dimension_semantics<parallel>], iteration_bounds = array<i64: 2>, scalar_prefetch = 0 : i64, scratch_operands = 0 : i64, tpu.core_type = #tpu.core_type<tc>, window_params = [{transform_indices = @transform_0, window_bounds = array<i64: 1, 8, 64>}, {transform_indices = @transform_1, window_bounds = array<i64: 1, 8, 8>}, {pipeline_mode = #tpu.pipeline_mode<synchronous>, transform_indices = @transform_2, window_bounds = array<i64: 64, 384>}, {pipeline_mode = #tpu.pipeline_mode<synchronous>, transform_indices = @transform_3, window_bounds = array<i64: 1, 384>}, {pipeline_mode = #tpu.pipeline_mode<synchronous>, transform_indices = @transform_4, window_bounds = array<i64: 64, 64>}, {pipeline_mode = #tpu.pipeline_mode<synchronous>, transform_indices = @transform_5, window_bounds = array<i64: 1, 64>}, {pipeline_mode = #tpu.pipeline_mode<synchronous>, transform_indices = @transform_6, window_bounds = array<i64: 1, 64>}, {pipeline_mode = #tpu.pipeline_mode<synchronous>, transform_indices = @transform_7, window_bounds = array<i64: 1, 64>}, {pipeline_mode = #tpu.pipeline_mode<synchronous>, transform_indices = @transform_8, window_bounds = array<i64: 64, 256>}, {pipeline_mode = #tpu.pipeline_mode<synchronous>, transform_indices = @transform_9, window_bounds = array<i64: 1, 256>}, {pipeline_mode = #tpu.pipeline_mode<synchronous>, transform_indices = @transform_10, window_bounds = array<i64: 256, 64>}, {pipeline_mode = #tpu.pipeline_mode<synchronous>, transform_indices = @transform_11, window_bounds = array<i64: 1, 64>}, {pipeline_mode = #tpu.pipeline_mode<synchronous>, transform_indices = @transform_12, window_bounds = array<i64: 1, 64>}, {pipeline_mode = #tpu.pipeline_mode<synchronous>, transform_indices = @transform_13, window_bounds = array<i64: 1, 64>}, {pipeline_mode = #tpu.pipeline_mode<synchronous>, transform_indices = @transform_14, window_bounds = array<i64: 64, 384>}, {pipeline_mode = #tpu.pipeline_mode<synchronous>, transform_indices = @transform_15, window_bounds = array<i64: 1, 384>}, {pipeline_mode = #tpu.pipeline_mode<synchronous>, transform_indices = @transform_16, window_bounds = array<i64: 64, 64>}, {pipeline_mode = #tpu.pipeline_mode<synchronous>, transform_indices = @transform_17, window_bounds = array<i64: 1, 64>}, {pipeline_mode = #tpu.pipeline_mode<synchronous>, transform_indices = @transform_18, window_bounds = array<i64: 1, 64>}, {pipeline_mode = #tpu.pipeline_mode<synchronous>, transform_indices = @transform_19, window_bounds = array<i64: 1, 64>}, {pipeline_mode = #tpu.pipeline_mode<synchronous>, transform_indices = @transform_20, window_bounds = array<i64: 64, 1024>}, {pipeline_mode = #tpu.pipeline_mode<synchronous>, transform_indices = @transform_21, window_bounds = array<i64: 1, 1024>}, {pipeline_mode = #tpu.pipeline_mode<synchronous>, transform_indices = @transform_22, window_bounds = array<i64: 1024, 64>}, {pipeline_mode = #tpu.pipeline_mode<synchronous>, transform_indices = @transform_23, window_bounds = array<i64: 4, 64>}, {pipeline_mode = #tpu.pipeline_mode<synchronous>, transform_indices = @transform_24, window_bounds = array<i64: 64, 4>}, {pipeline_mode = #tpu.pipeline_mode<synchronous>, transform_indices = @transform_25, window_bounds = array<i64: 1, 4>}, {pipeline_mode = #tpu.pipeline_mode<synchronous>, transform_indices = @transform_26, window_bounds = array<i64: 1, 64>}, {pipeline_mode = #tpu.pipeline_mode<synchronous>, transform_indices = @transform_27, window_bounds = array<i64: 1, 64>}, {transform_indices = @transform_28, window_bounds = array<i64: 1, 8, 64>}, {transform_indices = @transform_29, window_bounds = array<i64: 1, 8, 64>}]} {
    %c0 = arith.constant 0 : index
    %c0_0 = arith.constant 0 : index
    %c0_1 = arith.constant 0 : index
    %0 = vector.load %arg1[%c0, %c0_0, %c0_1] : memref<1x8x64xf32, #tpu.memory_space<vmem>>, vector<1x8x64xf32>
    %1 = vector.shape_cast %0 : vector<1x8x64xf32> to vector<8x64xf32>
    %c0_2 = arith.constant 0 : index
    %c0_3 = arith.constant 0 : index
    %c0_4 = arith.constant 0 : index
    %2 = vector.load %arg2[%c0_2, %c0_3, %c0_4] : memref<1x8x8xf32, #tpu.memory_space<vmem>>, vector<1x8x8xf32>
    %3 = vector.shape_cast %2 : vector<1x8x8xf32> to vector<8x8xf32>
    %4 = arith.truncf %1 : vector<8x64xf32> to vector<8x64xbf16>
    %c0_5 = arith.constant 0 : index
    %c0_6 = arith.constant 0 : index
    %5 = vector.load %arg3[%c0_5, %c0_6] : memref<64x384xbf16, #tpu.memory_space<vmem>>, vector<64x384xbf16>
    %cst = arith.constant dense<0.000000e+00> : vector<8x384xf32>
    %6 = tpu.matmul %4, %5, %cst {dimension_numbers = #tpu.dot_dimension_numbers<[1], [0], [0], [1], [0, 0, 1, 1], [], []>} : vector<8x64xbf16>, vector<64x384xbf16>, vector<8x384xf32> -> vector<8x384xf32>
    %c0_7 = arith.constant 0 : index
    %c0_8 = arith.constant 0 : index
    %7 = vector.load %arg4[%c0_7, %c0_8] : memref<1x384xf32, #tpu.memory_space<vmem>>, vector<1x384xf32>
    %8 = vector.shape_cast %7 : vector<1x384xf32> to vector<384xf32>
    %9 = vector.shape_cast %8 : vector<384xf32> to vector<1x384xf32>
    %10 = vector.broadcast %9 : vector<1x384xf32> to vector<8x384xf32>
    %11 = arith.addf %6, %10 : vector<8x384xf32>
    %12 = vector.extract_strided_slice %11 {offsets = [0, 0], sizes = [8, 32], strides = [1, 1]} : vector<8x384xf32> to vector<8x32xf32>
    %13 = vector.extract_strided_slice %11 {offsets = [0, 32], sizes = [8, 32], strides = [1, 1]} : vector<8x384xf32> to vector<8x32xf32>
    %14 = vector.shape_cast %12 : vector<8x32xf32> to vector<1x8x32xf32>
    %15 = vector.shape_cast %13 : vector<8x32xf32> to vector<1x8x32xf32>
    %16 = tpu.concatenate %14, %15 in 0 : vector<1x8x32xf32>, vector<1x8x32xf32> -> vector<2x8x32xf32>
    %17 = arith.truncf %16 : vector<2x8x32xf32> to vector<2x8x32xbf16>
    %18 = vector.extract_strided_slice %11 {offsets = [0, 128], sizes = [8, 32], strides = [1, 1]} : vector<8x384xf32> to vector<8x32xf32>
    %19 = vector.extract_strided_slice %11 {offsets = [0, 160], sizes = [8, 32], strides = [1, 1]} : vector<8x384xf32> to vector<8x32xf32>
    %20 = vector.shape_cast %18 : vector<8x32xf32> to vector<1x8x32xf32>
    %21 = vector.shape_cast %19 : vector<8x32xf32> to vector<1x8x32xf32>
    %22 = tpu.concatenate %20, %21 in 0 : vector<1x8x32xf32>, vector<1x8x32xf32> -> vector<2x8x32xf32>
    %23 = arith.truncf %22 : vector<2x8x32xf32> to vector<2x8x32xbf16>
    %24 = vector.extract_strided_slice %11 {offsets = [0, 256], sizes = [8, 32], strides = [1, 1]} : vector<8x384xf32> to vector<8x32xf32>
    %25 = vector.extract_strided_slice %11 {offsets = [0, 288], sizes = [8, 32], strides = [1, 1]} : vector<8x384xf32> to vector<8x32xf32>
    %26 = vector.shape_cast %24 : vector<8x32xf32> to vector<1x8x32xf32>
    %27 = vector.shape_cast %25 : vector<8x32xf32> to vector<1x8x32xf32>
    %28 = tpu.concatenate %26, %27 in 0 : vector<1x8x32xf32>, vector<1x8x32xf32> -> vector<2x8x32xf32>
    %29 = arith.truncf %28 : vector<2x8x32xf32> to vector<2x8x32xbf16>
    "tpu.trace_start"() <{level = 10 : i32, message = "hqd,hkd->hqk"}> : () -> ()
    %cst_9 = arith.constant dense<0.000000e+00> : vector<2x8x8xf32>
    %30 = tpu.matmul %17, %23, %cst_9 {dimension_numbers = #tpu.dot_dimension_numbers<[2], [2], [1], [1], [0, 0, 0, 1, 1, 1], [0], [0]>} : vector<2x8x32xbf16>, vector<2x8x32xbf16>, vector<2x8x8xf32> -> vector<2x8x8xf32>
    "tpu.trace_stop"() : () -> ()
    %31 = vector.shape_cast %3 : vector<8x8xf32> to vector<1x8x8xf32>
    %32 = vector.broadcast %31 : vector<1x8x8xf32> to vector<2x8x8xf32>
    %33 = arith.addf %30, %32 : vector<2x8x8xf32>
    %cst_10 = arith.constant dense<0xFF800000> : vector<2x8xf32>
    %34 = vector.multi_reduction <maximumf>, %33, %cst_10 [2] : vector<2x8x8xf32> to vector<2x8xf32>
    %35 = vector.shape_cast %34 : vector<2x8xf32> to vector<2x8x1xf32>
    %36 = vector.broadcast %35 : vector<2x8x1xf32> to vector<2x8x8xf32>
    %37 = arith.subf %33, %36 : vector<2x8x8xf32>
    %38 = math.exp %37 : vector<2x8x8xf32>
    %cst_11 = arith.constant dense<0.000000e+00> : vector<2x8xf32>
    %39 = vector.multi_reduction <add>, %38, %cst_11 [2] : vector<2x8x8xf32> to vector<2x8xf32>
    %40 = vector.shape_cast %39 : vector<2x8xf32> to vector<2x8x1xf32>
    %41 = tpu.reciprocal %40 {approx = true} : vector<2x8x1xf32> -> vector<2x8x1xf32>
    %42 = vector.broadcast %41 : vector<2x8x1xf32> to vector<2x8x8xf32>
    %43 = arith.mulf %38, %42 : vector<2x8x8xf32>
    %44 = arith.truncf %43 : vector<2x8x8xf32> to vector<2x8x8xbf16>
    "tpu.trace_start"() <{level = 10 : i32, message = "hqk,hkd->hqd"}> : () -> ()
    %cst_12 = arith.constant dense<0.000000e+00> : vector<2x8x32xf32>
    %45 = tpu.matmul %44, %29, %cst_12 {dimension_numbers = #tpu.dot_dimension_numbers<[2], [1], [1], [2], [0, 0, 0, 1, 1, 2], [0], [0]>} : vector<2x8x8xbf16>, vector<2x8x32xbf16>, vector<2x8x32xf32> -> vector<2x8x32xf32>
    "tpu.trace_stop"() : () -> ()
    %46 = vector.extract_strided_slice %45 {offsets = [0, 0, 0], sizes = [1, 8, 32], strides = [1, 1, 1]} : vector<2x8x32xf32> to vector<1x8x32xf32>
    %47 = vector.shape_cast %46 : vector<1x8x32xf32> to vector<8x32xf32>
    %48 = vector.extract_strided_slice %45 {offsets = [1, 0, 0], sizes = [1, 8, 32], strides = [1, 1, 1]} : vector<2x8x32xf32> to vector<1x8x32xf32>
    %49 = vector.shape_cast %48 : vector<1x8x32xf32> to vector<8x32xf32>
    %50 = tpu.concatenate %47, %49 in 1 : vector<8x32xf32>, vector<8x32xf32> -> vector<8x64xf32>
    %51 = arith.truncf %50 : vector<8x64xf32> to vector<8x64xbf16>
    %c0_13 = arith.constant 0 : index
    %c0_14 = arith.constant 0 : index
    %52 = vector.load %arg5[%c0_13, %c0_14] : memref<64x64xbf16, #tpu.memory_space<vmem>>, vector<64x64xbf16>
    %cst_15 = arith.constant dense<0.000000e+00> : vector<8x64xf32>
    %53 = tpu.matmul %51, %52, %cst_15 {dimension_numbers = #tpu.dot_dimension_numbers<[1], [0], [0], [1], [0, 0, 1, 1], [], []>} : vector<8x64xbf16>, vector<64x64xbf16>, vector<8x64xf32> -> vector<8x64xf32>
    %c0_16 = arith.constant 0 : index
    %c0_17 = arith.constant 0 : index
    %54 = vector.load %arg6[%c0_16, %c0_17] : memref<1x64xf32, #tpu.memory_space<vmem>>, vector<1x64xf32>
    %55 = vector.shape_cast %54 : vector<1x64xf32> to vector<64xf32>
    %56 = vector.shape_cast %55 : vector<64xf32> to vector<1x64xf32>
    %57 = vector.broadcast %56 : vector<1x64xf32> to vector<8x64xf32>
    %58 = arith.addf %53, %57 : vector<8x64xf32>
    %59 = arith.addf %58, %1 : vector<8x64xf32>
    %c0_18 = arith.constant 0 : index
    %c0_19 = arith.constant 0 : index
    %60 = vector.load %arg7[%c0_18, %c0_19] : memref<1x64xf32, #tpu.memory_space<vmem>>, vector<1x64xf32>
    %61 = vector.shape_cast %60 : vector<1x64xf32> to vector<64xf32>
    %c0_20 = arith.constant 0 : index
    %c0_21 = arith.constant 0 : index
    %62 = vector.load %arg8[%c0_20, %c0_21] : memref<1x64xf32, #tpu.memory_space<vmem>>, vector<1x64xf32>
    %63 = vector.shape_cast %62 : vector<1x64xf32> to vector<64xf32>
    %cst_22 = arith.constant dense<0.000000e+00> : vector<8xf32>
    %64 = vector.multi_reduction <add>, %59, %cst_22 [1] : vector<8x64xf32> to vector<8xf32>
    %65 = vector.shape_cast %64 : vector<8xf32> to vector<8x1xf32>
    %cst_23 = arith.constant 6.400000e+01 : f32
    %66 = vector.broadcast %cst_23 : f32 to vector<8x1xf32>
    %67 = arith.divf %65, %66 : vector<8x1xf32>
    %68 = vector.broadcast %67 : vector<8x1xf32> to vector<8x64xf32>
    %69 = arith.subf %59, %68 : vector<8x64xf32>
    %70 = arith.mulf %69, %69 : vector<8x64xf32>
    %cst_24 = arith.constant dense<0.000000e+00> : vector<8xf32>
    %71 = vector.multi_reduction <add>, %70, %cst_24 [1] : vector<8x64xf32> to vector<8xf32>
    %72 = vector.shape_cast %71 : vector<8xf32> to vector<8x1xf32>
    %cst_25 = arith.constant 6.400000e+01 : f32
    %73 = vector.broadcast %cst_25 : f32 to vector<8x1xf32>
    %74 = arith.divf %72, %73 : vector<8x1xf32>
    %75 = vector.broadcast %67 : vector<8x1xf32> to vector<8x64xf32>
    %76 = arith.subf %59, %75 : vector<8x64xf32>
    %cst_26 = arith.constant 9.99999996E-13 : f32
    %77 = vector.broadcast %cst_26 : f32 to vector<8x1xf32>
    %78 = arith.addf %74, %77 : vector<8x1xf32>
    %79 = math.rsqrt %78 : vector<8x1xf32>
    %80 = vector.broadcast %79 : vector<8x1xf32> to vector<8x64xf32>
    %81 = arith.mulf %76, %80 : vector<8x64xf32>
    %82 = vector.shape_cast %61 : vector<64xf32> to vector<1x64xf32>
    %83 = vector.broadcast %82 : vector<1x64xf32> to vector<8x64xf32>
    %84 = arith.mulf %81, %83 : vector<8x64xf32>
    %85 = vector.shape_cast %63 : vector<64xf32> to vector<1x64xf32>
    %86 = vector.broadcast %85 : vector<1x64xf32> to vector<8x64xf32>
    %87 = arith.addf %84, %86 : vector<8x64xf32>
    %88 = arith.truncf %87 : vector<8x64xf32> to vector<8x64xbf16>
    %c0_27 = arith.constant 0 : index
    %c0_28 = arith.constant 0 : index
    %89 = vector.load %arg9[%c0_27, %c0_28] : memref<64x256xbf16, #tpu.memory_space<vmem>>, vector<64x256xbf16>
    %cst_29 = arith.constant dense<0.000000e+00> : vector<8x256xf32>
    %90 = tpu.matmul %88, %89, %cst_29 {dimension_numbers = #tpu.dot_dimension_numbers<[1], [0], [0], [1], [0, 0, 1, 1], [], []>} : vector<8x64xbf16>, vector<64x256xbf16>, vector<8x256xf32> -> vector<8x256xf32>
    %c0_30 = arith.constant 0 : index
    %c0_31 = arith.constant 0 : index
    %91 = vector.load %arg10[%c0_30, %c0_31] : memref<1x256xf32, #tpu.memory_space<vmem>>, vector<1x256xf32>
    %92 = vector.shape_cast %91 : vector<1x256xf32> to vector<256xf32>
    %93 = vector.shape_cast %92 : vector<256xf32> to vector<1x256xf32>
    %94 = vector.broadcast %93 : vector<1x256xf32> to vector<8x256xf32>
    %95 = arith.addf %90, %94 : vector<8x256xf32>
    %cst_32 = arith.constant 5.000000e-01 : f32
    %96 = vector.broadcast %cst_32 : f32 to vector<8x256xf32>
    %97 = arith.mulf %96, %95 : vector<8x256xf32>
    %cst_33 = arith.constant 4.471500e-02 : f32
    %98 = vector.broadcast %cst_33 : f32 to vector<8x256xf32>
    %99 = arith.mulf %98, %95 : vector<8x256xf32>
    %100 = arith.mulf %99, %95 : vector<8x256xf32>
    %101 = arith.mulf %100, %95 : vector<8x256xf32>
    %102 = arith.addf %95, %101 : vector<8x256xf32>
    %cst_34 = arith.constant 0.797884583 : f32
    %103 = vector.broadcast %cst_34 : f32 to vector<8x256xf32>
    %104 = arith.mulf %103, %102 : vector<8x256xf32>
    %105 = math.tanh %104 : vector<8x256xf32>
    %cst_35 = arith.constant 1.000000e+00 : f32
    %106 = vector.broadcast %cst_35 : f32 to vector<8x256xf32>
    %107 = arith.addf %106, %105 : vector<8x256xf32>
    %108 = arith.mulf %97, %107 : vector<8x256xf32>
    %109 = arith.truncf %108 : vector<8x256xf32> to vector<8x256xbf16>
    %c0_36 = arith.constant 0 : index
    %c0_37 = arith.constant 0 : index
    %110 = vector.load %arg11[%c0_36, %c0_37] : memref<256x64xbf16, #tpu.memory_space<vmem>>, vector<256x64xbf16>
    %cst_38 = arith.constant dense<0.000000e+00> : vector<8x64xf32>
    %111 = tpu.matmul %109, %110, %cst_38 {dimension_numbers = #tpu.dot_dimension_numbers<[1], [0], [0], [1], [0, 0, 1, 1], [], []>} : vector<8x256xbf16>, vector<256x64xbf16>, vector<8x64xf32> -> vector<8x64xf32>
    %c0_39 = arith.constant 0 : index
    %c0_40 = arith.constant 0 : index
    %112 = vector.load %arg12[%c0_39, %c0_40] : memref<1x64xf32, #tpu.memory_space<vmem>>, vector<1x64xf32>
    %113 = vector.shape_cast %112 : vector<1x64xf32> to vector<64xf32>
    %114 = vector.shape_cast %113 : vector<64xf32> to vector<1x64xf32>
    %115 = vector.broadcast %114 : vector<1x64xf32> to vector<8x64xf32>
    %116 = arith.addf %111, %115 : vector<8x64xf32>
    %117 = arith.addf %116, %87 : vector<8x64xf32>
    %c0_41 = arith.constant 0 : index
    %c0_42 = arith.constant 0 : index
    %118 = vector.load %arg13[%c0_41, %c0_42] : memref<1x64xf32, #tpu.memory_space<vmem>>, vector<1x64xf32>
    %119 = vector.shape_cast %118 : vector<1x64xf32> to vector<64xf32>
    %c0_43 = arith.constant 0 : index
    %c0_44 = arith.constant 0 : index
    %120 = vector.load %arg14[%c0_43, %c0_44] : memref<1x64xf32, #tpu.memory_space<vmem>>, vector<1x64xf32>
    %121 = vector.shape_cast %120 : vector<1x64xf32> to vector<64xf32>
    %cst_45 = arith.constant dense<0.000000e+00> : vector<8xf32>
    %122 = vector.multi_reduction <add>, %117, %cst_45 [1] : vector<8x64xf32> to vector<8xf32>
    %123 = vector.shape_cast %122 : vector<8xf32> to vector<8x1xf32>
    %cst_46 = arith.constant 6.400000e+01 : f32
    %124 = vector.broadcast %cst_46 : f32 to vector<8x1xf32>
    %125 = arith.divf %123, %124 : vector<8x1xf32>
    %126 = vector.broadcast %125 : vector<8x1xf32> to vector<8x64xf32>
    %127 = arith.subf %117, %126 : vector<8x64xf32>
    %128 = arith.mulf %127, %127 : vector<8x64xf32>
    %cst_47 = arith.constant dense<0.000000e+00> : vector<8xf32>
    %129 = vector.multi_reduction <add>, %128, %cst_47 [1] : vector<8x64xf32> to vector<8xf32>
    %130 = vector.shape_cast %129 : vector<8xf32> to vector<8x1xf32>
    %cst_48 = arith.constant 6.400000e+01 : f32
    %131 = vector.broadcast %cst_48 : f32 to vector<8x1xf32>
    %132 = arith.divf %130, %131 : vector<8x1xf32>
    %133 = vector.broadcast %125 : vector<8x1xf32> to vector<8x64xf32>
    %134 = arith.subf %117, %133 : vector<8x64xf32>
    %cst_49 = arith.constant 9.99999996E-13 : f32
    %135 = vector.broadcast %cst_49 : f32 to vector<8x1xf32>
    %136 = arith.addf %132, %135 : vector<8x1xf32>
    %137 = math.rsqrt %136 : vector<8x1xf32>
    %138 = vector.broadcast %137 : vector<8x1xf32> to vector<8x64xf32>
    %139 = arith.mulf %134, %138 : vector<8x64xf32>
    %140 = vector.shape_cast %119 : vector<64xf32> to vector<1x64xf32>
    %141 = vector.broadcast %140 : vector<1x64xf32> to vector<8x64xf32>
    %142 = arith.mulf %139, %141 : vector<8x64xf32>
    %143 = vector.shape_cast %121 : vector<64xf32> to vector<1x64xf32>
    %144 = vector.broadcast %143 : vector<1x64xf32> to vector<8x64xf32>
    %145 = arith.addf %142, %144 : vector<8x64xf32>
    %146 = vector.shape_cast %145 : vector<8x64xf32> to vector<1x8x64xf32>
    %c0_50 = arith.constant 0 : index
    %c0_51 = arith.constant 0 : index
    %c0_52 = arith.constant 0 : index
    %147 = vector.load %arg29[%c0_50, %c0_51, %c0_52] : memref<1x8x64xf32, #tpu.memory_space<vmem>>, vector<1x8x64xf32>
    tpu.vector_store %arg29[%c0_50, %c0_51, %c0_52], %146 {strides = array<i32>} : memref<1x8x64xf32, #tpu.memory_space<vmem>>, vector<1x8x64xf32>,
    %148 = arith.truncf %145 : vector<8x64xf32> to vector<8x64xbf16>
    %c0_53 = arith.constant 0 : index
    %c0_54 = arith.constant 0 : index
    %149 = vector.load %arg15[%c0_53, %c0_54] : memref<64x384xbf16, #tpu.memory_space<vmem>>, vector<64x384xbf16>
    %cst_55 = arith.constant dense<0.000000e+00> : vector<8x384xf32>
    %150 = tpu.matmul %148, %149, %cst_55 {dimension_numbers = #tpu.dot_dimension_numbers<[1], [0], [0], [1], [0, 0, 1, 1], [], []>} : vector<8x64xbf16>, vector<64x384xbf16>, vector<8x384xf32> -> vector<8x384xf32>
    %c0_56 = arith.constant 0 : index
    %c0_57 = arith.constant 0 : index
    %151 = vector.load %arg16[%c0_56, %c0_57] : memref<1x384xf32, #tpu.memory_space<vmem>>, vector<1x384xf32>
    %152 = vector.shape_cast %151 : vector<1x384xf32> to vector<384xf32>
    %153 = vector.shape_cast %152 : vector<384xf32> to vector<1x384xf32>
    %154 = vector.broadcast %153 : vector<1x384xf32> to vector<8x384xf32>
    %155 = arith.addf %150, %154 : vector<8x384xf32>
    %156 = vector.extract_strided_slice %155 {offsets = [0, 0], sizes = [8, 32], strides = [1, 1]} : vector<8x384xf32> to vector<8x32xf32>
    %157 = vector.extract_strided_slice %155 {offsets = [0, 32], sizes = [8, 32], strides = [1, 1]} : vector<8x384xf32> to vector<8x32xf32>
    %158 = vector.shape_cast %156 : vector<8x32xf32> to vector<1x8x32xf32>
    %159 = vector.shape_cast %157 : vector<8x32xf32> to vector<1x8x32xf32>
    %160 = tpu.concatenate %158, %159 in 0 : vector<1x8x32xf32>, vector<1x8x32xf32> -> vector<2x8x32xf32>
    %161 = arith.truncf %160 : vector<2x8x32xf32> to vector<2x8x32xbf16>
    %162 = vector.extract_strided_slice %155 {offsets = [0, 128], sizes = [8, 32], strides = [1, 1]} : vector<8x384xf32> to vector<8x32xf32>
    %163 = vector.extract_strided_slice %155 {offsets = [0, 160], sizes = [8, 32], strides = [1, 1]} : vector<8x384xf32> to vector<8x32xf32>
    %164 = vector.shape_cast %162 : vector<8x32xf32> to vector<1x8x32xf32>
    %165 = vector.shape_cast %163 : vector<8x32xf32> to vector<1x8x32xf32>
    %166 = tpu.concatenate %164, %165 in 0 : vector<1x8x32xf32>, vector<1x8x32xf32> -> vector<2x8x32xf32>
    %167 = arith.truncf %166 : vector<2x8x32xf32> to vector<2x8x32xbf16>
    %168 = vector.extract_strided_slice %155 {offsets = [0, 256], sizes = [8, 32], strides = [1, 1]} : vector<8x384xf32> to vector<8x32xf32>
    %169 = vector.extract_strided_slice %155 {offsets = [0, 288], sizes = [8, 32], strides = [1, 1]} : vector<8x384xf32> to vector<8x32xf32>
    %170 = vector.shape_cast %168 : vector<8x32xf32> to vector<1x8x32xf32>
    %171 = vector.shape_cast %169 : vector<8x32xf32> to vector<1x8x32xf32>
    %172 = tpu.concatenate %170, %171 in 0 : vector<1x8x32xf32>, vector<1x8x32xf32> -> vector<2x8x32xf32>
    %173 = arith.truncf %172 : vector<2x8x32xf32> to vector<2x8x32xbf16>
    "tpu.trace_start"() <{level = 10 : i32, message = "hqd,hkd->hqk"}> : () -> ()
    %cst_58 = arith.constant dense<0.000000e+00> : vector<2x8x8xf32>
    %174 = tpu.matmul %161, %167, %cst_58 {dimension_numbers = #tpu.dot_dimension_numbers<[2], [2], [1], [1], [0, 0, 0, 1, 1, 1], [0], [0]>} : vector<2x8x32xbf16>, vector<2x8x32xbf16>, vector<2x8x8xf32> -> vector<2x8x8xf32>
    "tpu.trace_stop"() : () -> ()
    %175 = vector.shape_cast %3 : vector<8x8xf32> to vector<1x8x8xf32>
    %176 = vector.broadcast %175 : vector<1x8x8xf32> to vector<2x8x8xf32>
    %177 = arith.addf %174, %176 : vector<2x8x8xf32>
    %cst_59 = arith.constant dense<0xFF800000> : vector<2x8xf32>
    %178 = vector.multi_reduction <maximumf>, %177, %cst_59 [2] : vector<2x8x8xf32> to vector<2x8xf32>
    %179 = vector.shape_cast %178 : vector<2x8xf32> to vector<2x8x1xf32>
    %180 = vector.broadcast %179 : vector<2x8x1xf32> to vector<2x8x8xf32>
    %181 = arith.subf %177, %180 : vector<2x8x8xf32>
    %182 = math.exp %181 : vector<2x8x8xf32>
    %cst_60 = arith.constant dense<0.000000e+00> : vector<2x8xf32>
    %183 = vector.multi_reduction <add>, %182, %cst_60 [2] : vector<2x8x8xf32> to vector<2x8xf32>
    %184 = vector.shape_cast %183 : vector<2x8xf32> to vector<2x8x1xf32>
    %185 = tpu.reciprocal %184 {approx = true} : vector<2x8x1xf32> -> vector<2x8x1xf32>
    %186 = vector.broadcast %185 : vector<2x8x1xf32> to vector<2x8x8xf32>
    %187 = arith.mulf %182, %186 : vector<2x8x8xf32>
    %188 = arith.truncf %187 : vector<2x8x8xf32> to vector<2x8x8xbf16>
    "tpu.trace_start"() <{level = 10 : i32, message = "hqk,hkd->hqd"}> : () -> ()
    %cst_61 = arith.constant dense<0.000000e+00> : vector<2x8x32xf32>
    %189 = tpu.matmul %188, %173, %cst_61 {dimension_numbers = #tpu.dot_dimension_numbers<[2], [1], [1], [2], [0, 0, 0, 1, 1, 2], [0], [0]>} : vector<2x8x8xbf16>, vector<2x8x32xbf16>, vector<2x8x32xf32> -> vector<2x8x32xf32>
    "tpu.trace_stop"() : () -> ()
    %190 = vector.extract_strided_slice %189 {offsets = [0, 0, 0], sizes = [1, 8, 32], strides = [1, 1, 1]} : vector<2x8x32xf32> to vector<1x8x32xf32>
    %191 = vector.shape_cast %190 : vector<1x8x32xf32> to vector<8x32xf32>
    %192 = vector.extract_strided_slice %189 {offsets = [1, 0, 0], sizes = [1, 8, 32], strides = [1, 1, 1]} : vector<2x8x32xf32> to vector<1x8x32xf32>
    %193 = vector.shape_cast %192 : vector<1x8x32xf32> to vector<8x32xf32>
    %194 = tpu.concatenate %191, %193 in 1 : vector<8x32xf32>, vector<8x32xf32> -> vector<8x64xf32>
    %195 = arith.truncf %194 : vector<8x64xf32> to vector<8x64xbf16>
    %c0_62 = arith.constant 0 : index
    %c0_63 = arith.constant 0 : index
    %196 = vector.load %arg17[%c0_62, %c0_63] : memref<64x64xbf16, #tpu.memory_space<vmem>>, vector<64x64xbf16>
    %cst_64 = arith.constant dense<0.000000e+00> : vector<8x64xf32>
    %197 = tpu.matmul %195, %196, %cst_64 {dimension_numbers = #tpu.dot_dimension_numbers<[1], [0], [0], [1], [0, 0, 1, 1], [], []>} : vector<8x64xbf16>, vector<64x64xbf16>, vector<8x64xf32> -> vector<8x64xf32>
    %c0_65 = arith.constant 0 : index
    %c0_66 = arith.constant 0 : index
    %198 = vector.load %arg18[%c0_65, %c0_66] : memref<1x64xf32, #tpu.memory_space<vmem>>, vector<1x64xf32>
    %199 = vector.shape_cast %198 : vector<1x64xf32> to vector<64xf32>
    %200 = vector.shape_cast %199 : vector<64xf32> to vector<1x64xf32>
    %201 = vector.broadcast %200 : vector<1x64xf32> to vector<8x64xf32>
    %202 = arith.addf %197, %201 : vector<8x64xf32>
    %203 = arith.addf %202, %145 : vector<8x64xf32>
    %c0_67 = arith.constant 0 : index
    %c0_68 = arith.constant 0 : index
    %204 = vector.load %arg19[%c0_67, %c0_68] : memref<1x64xf32, #tpu.memory_space<vmem>>, vector<1x64xf32>
    %205 = vector.shape_cast %204 : vector<1x64xf32> to vector<64xf32>
    %c0_69 = arith.constant 0 : index
    %c0_70 = arith.constant 0 : index
    %206 = vector.load %arg20[%c0_69, %c0_70] : memref<1x64xf32, #tpu.memory_space<vmem>>, vector<1x64xf32>
    %207 = vector.shape_cast %206 : vector<1x64xf32> to vector<64xf32>
    %cst_71 = arith.constant dense<0.000000e+00> : vector<8xf32>
    %208 = vector.multi_reduction <add>, %203, %cst_71 [1] : vector<8x64xf32> to vector<8xf32>
    %209 = vector.shape_cast %208 : vector<8xf32> to vector<8x1xf32>
    %cst_72 = arith.constant 6.400000e+01 : f32
    %210 = vector.broadcast %cst_72 : f32 to vector<8x1xf32>
    %211 = arith.divf %209, %210 : vector<8x1xf32>
    %212 = vector.broadcast %211 : vector<8x1xf32> to vector<8x64xf32>
    %213 = arith.subf %203, %212 : vector<8x64xf32>
    %214 = arith.mulf %213, %213 : vector<8x64xf32>
    %cst_73 = arith.constant dense<0.000000e+00> : vector<8xf32>
    %215 = vector.multi_reduction <add>, %214, %cst_73 [1] : vector<8x64xf32> to vector<8xf32>
    %216 = vector.shape_cast %215 : vector<8xf32> to vector<8x1xf32>
    %cst_74 = arith.constant 6.400000e+01 : f32
    %217 = vector.broadcast %cst_74 : f32 to vector<8x1xf32>
    %218 = arith.divf %216, %217 : vector<8x1xf32>
    %219 = vector.broadcast %211 : vector<8x1xf32> to vector<8x64xf32>
    %220 = arith.subf %203, %219 : vector<8x64xf32>
    %cst_75 = arith.constant 9.99999996E-13 : f32
    %221 = vector.broadcast %cst_75 : f32 to vector<8x1xf32>
    %222 = arith.addf %218, %221 : vector<8x1xf32>
    %223 = math.rsqrt %222 : vector<8x1xf32>
    %224 = vector.broadcast %223 : vector<8x1xf32> to vector<8x64xf32>
    %225 = arith.mulf %220, %224 : vector<8x64xf32>
    %226 = vector.shape_cast %205 : vector<64xf32> to vector<1x64xf32>
    %227 = vector.broadcast %226 : vector<1x64xf32> to vector<8x64xf32>
    %228 = arith.mulf %225, %227 : vector<8x64xf32>
    %229 = vector.shape_cast %207 : vector<64xf32> to vector<1x64xf32>
    %230 = vector.broadcast %229 : vector<1x64xf32> to vector<8x64xf32>
    %231 = arith.addf %228, %230 : vector<8x64xf32>
    %232 = arith.truncf %231 : vector<8x64xf32> to vector<8x64xbf16>
    %c0_76 = arith.constant 0 : index
    %c0_77 = arith.constant 0 : index
    %233 = vector.load %arg21[%c0_76, %c0_77] : memref<64x1024xbf16, #tpu.memory_space<vmem>>, vector<64x1024xbf16>
    %cst_78 = arith.constant dense<0.000000e+00> : vector<8x1024xf32>
    %234 = tpu.matmul %232, %233, %cst_78 {dimension_numbers = #tpu.dot_dimension_numbers<[1], [0], [0], [1], [0, 0, 1, 1], [], []>} : vector<8x64xbf16>, vector<64x1024xbf16>, vector<8x1024xf32> -> vector<8x1024xf32>
    %c0_79 = arith.constant 0 : index
    %c0_80 = arith.constant 0 : index
    %235 = vector.load %arg22[%c0_79, %c0_80] : memref<1x1024xf32, #tpu.memory_space<vmem>>, vector<1x1024xf32>
    %236 = vector.shape_cast %235 : vector<1x1024xf32> to vector<1024xf32>
    %237 = vector.shape_cast %236 : vector<1024xf32> to vector<1x1024xf32>
    %238 = vector.broadcast %237 : vector<1x1024xf32> to vector<8x1024xf32>
    %239 = arith.addf %234, %238 : vector<8x1024xf32>
    %cst_81 = arith.constant 5.000000e-01 : f32
    %240 = vector.broadcast %cst_81 : f32 to vector<8x1024xf32>
    %241 = arith.mulf %240, %239 : vector<8x1024xf32>
    %cst_82 = arith.constant 4.471500e-02 : f32
    %242 = vector.broadcast %cst_82 : f32 to vector<8x1024xf32>
    %243 = arith.mulf %242, %239 : vector<8x1024xf32>
    %244 = arith.mulf %243, %239 : vector<8x1024xf32>
    %245 = arith.mulf %244, %239 : vector<8x1024xf32>
    %246 = arith.addf %239, %245 : vector<8x1024xf32>
    %cst_83 = arith.constant 0.797884583 : f32
    %247 = vector.broadcast %cst_83 : f32 to vector<8x1024xf32>
    %248 = arith.mulf %247, %246 : vector<8x1024xf32>
    %249 = math.tanh %248 : vector<8x1024xf32>
    %cst_84 = arith.constant 1.000000e+00 : f32
    %250 = vector.broadcast %cst_84 : f32 to vector<8x1024xf32>
    %251 = arith.addf %250, %249 : vector<8x1024xf32>
    %252 = arith.mulf %241, %251 : vector<8x1024xf32>
    %c0_85 = arith.constant 0 : index
    %c0_86 = arith.constant 0 : index
    %253 = vector.load %arg25[%c0_85, %c0_86] : memref<64x4xbf16, #tpu.memory_space<vmem>>, vector<64x4xbf16>
    %cst_87 = arith.constant dense<0.000000e+00> : vector<8x4xf32>
    %254 = tpu.matmul %232, %253, %cst_87 {dimension_numbers = #tpu.dot_dimension_numbers<[1], [0], [0], [1], [0, 0, 1, 1], [], []>} : vector<8x64xbf16>, vector<64x4xbf16>, vector<8x4xf32> -> vector<8x4xf32>
    %c0_88 = arith.constant 0 : index
    %c0_89 = arith.constant 0 : index
    %255 = vector.load %arg26[%c0_88, %c0_89] : memref<1x4xf32, #tpu.memory_space<vmem>>, vector<1x4xf32>
    %256 = vector.shape_cast %255 : vector<1x4xf32> to vector<4xf32>
    %257 = vector.shape_cast %256 : vector<4xf32> to vector<1x4xf32>
    %258 = vector.broadcast %257 : vector<1x4xf32> to vector<8x4xf32>
    %259 = arith.addf %254, %258 : vector<8x4xf32>
    %cst_90 = arith.constant dense<0xFF800000> : vector<8xf32>
    %260 = vector.multi_reduction <maximumf>, %259, %cst_90 [1] : vector<8x4xf32> to vector<8xf32>
    %261 = vector.shape_cast %260 : vector<8xf32> to vector<8x1xf32>
    %262 = vector.broadcast %261 : vector<8x1xf32> to vector<8x4xf32>
    %263 = arith.subf %259, %262 : vector<8x4xf32>
    %264 = math.exp %263 : vector<8x4xf32>
    %cst_91 = arith.constant dense<0.000000e+00> : vector<8xf32>
    %265 = vector.multi_reduction <add>, %264, %cst_91 [1] : vector<8x4xf32> to vector<8xf32>
    %266 = vector.shape_cast %265 : vector<8xf32> to vector<8x1xf32>
    %267 = vector.broadcast %266 : vector<8x1xf32> to vector<8x4xf32>
    %268 = arith.divf %264, %267 : vector<8x4xf32>
    %269 = vector.extract_strided_slice %252 {offsets = [0, 0], sizes = [8, 256], strides = [1, 1]} : vector<8x1024xf32> to vector<8x256xf32>
    %270 = vector.extract_strided_slice %268 {offsets = [0, 0], sizes = [8, 1], strides = [1, 1]} : vector<8x4xf32> to vector<8x1xf32>
    %271 = vector.broadcast %270 : vector<8x1xf32> to vector<8x256xf32>
    %272 = arith.mulf %269, %271 : vector<8x256xf32>
    %273 = vector.extract_strided_slice %252 {offsets = [0, 256], sizes = [8, 256], strides = [1, 1]} : vector<8x1024xf32> to vector<8x256xf32>
    %274 = vector.extract_strided_slice %268 {offsets = [0, 1], sizes = [8, 1], strides = [1, 1]} : vector<8x4xf32> to vector<8x1xf32>
    %275 = vector.broadcast %274 : vector<8x1xf32> to vector<8x256xf32>
    %276 = arith.mulf %273, %275 : vector<8x256xf32>
    %277 = vector.extract_strided_slice %252 {offsets = [0, 512], sizes = [8, 256], strides = [1, 1]} : vector<8x1024xf32> to vector<8x256xf32>
    %278 = vector.extract_strided_slice %268 {offsets = [0, 2], sizes = [8, 1], strides = [1, 1]} : vector<8x4xf32> to vector<8x1xf32>
    %279 = vector.broadcast %278 : vector<8x1xf32> to vector<8x256xf32>
    %280 = arith.mulf %277, %279 : vector<8x256xf32>
    %281 = vector.extract_strided_slice %252 {offsets = [0, 768], sizes = [8, 256], strides = [1, 1]} : vector<8x1024xf32> to vector<8x256xf32>
    %282 = vector.extract_strided_slice %268 {offsets = [0, 3], sizes = [8, 1], strides = [1, 1]} : vector<8x4xf32> to vector<8x1xf32>
    %283 = vector.broadcast %282 : vector<8x1xf32> to vector<8x256xf32>
    %284 = arith.mulf %281, %283 : vector<8x256xf32>
    %285 = tpu.concatenate %272, %276, %280, %284 in 1 : vector<8x256xf32>, vector<8x256xf32>, vector<8x256xf32>, vector<8x256xf32> -> vector<8x1024xf32>
    %286 = arith.truncf %285 : vector<8x1024xf32> to vector<8x1024xbf16>
    %c0_92 = arith.constant 0 : index
    %c0_93 = arith.constant 0 : index
    %287 = vector.load %arg23[%c0_92, %c0_93] : memref<1024x64xbf16, #tpu.memory_space<vmem>>, vector<1024x64xbf16>
    %cst_94 = arith.constant dense<0.000000e+00> : vector<8x64xf32>
    %288 = tpu.matmul %286, %287, %cst_94 {dimension_numbers = #tpu.dot_dimension_numbers<[1], [0], [0], [1], [0, 0, 1, 1], [], []>} : vector<8x1024xbf16>, vector<1024x64xbf16>, vector<8x64xf32> -> vector<8x64xf32>
    %289 = vector.extract_strided_slice %268 {offsets = [0, 0], sizes = [8, 1], strides = [1, 1]} : vector<8x4xf32> to vector<8x1xf32>
    %c0_95 = arith.constant 0 : index
    %c0_96 = arith.constant 0 : index
    %290 = vector.load %arg24[%c0_95, %c0_96] : memref<4x64xf32, #tpu.memory_space<vmem>>, vector<1x64xf32>
    %291 = vector.shape_cast %290 : vector<1x64xf32> to vector<64xf32>
    %292 = vector.shape_cast %291 : vector<64xf32> to vector<1x64xf32>
    %293 = vector.broadcast %289 : vector<8x1xf32> to vector<8x64xf32>
    %294 = vector.broadcast %292 : vector<1x64xf32> to vector<8x64xf32>
    %295 = arith.mulf %293, %294 : vector<8x64xf32>
    %296 = vector.extract_strided_slice %268 {offsets = [0, 1], sizes = [8, 1], strides = [1, 1]} : vector<8x4xf32> to vector<8x1xf32>
    %c1 = arith.constant 1 : index
    %c0_97 = arith.constant 0 : index
    %297 = vector.load %arg24[%c1, %c0_97] : memref<4x64xf32, #tpu.memory_space<vmem>>, vector<1x64xf32>
    %298 = vector.shape_cast %297 : vector<1x64xf32> to vector<64xf32>
    %299 = vector.shape_cast %298 : vector<64xf32> to vector<1x64xf32>
    %300 = vector.broadcast %296 : vector<8x1xf32> to vector<8x64xf32>
    %301 = vector.broadcast %299 : vector<1x64xf32> to vector<8x64xf32>
    %302 = arith.mulf %300, %301 : vector<8x64xf32>
    %303 = arith.addf %295, %302 : vector<8x64xf32>
    %304 = vector.extract_strided_slice %268 {offsets = [0, 2], sizes = [8, 1], strides = [1, 1]} : vector<8x4xf32> to vector<8x1xf32>
    %c2 = arith.constant 2 : index
    %c0_98 = arith.constant 0 : index
    %305 = vector.load %arg24[%c2, %c0_98] : memref<4x64xf32, #tpu.memory_space<vmem>>, vector<1x64xf32>
    %306 = vector.shape_cast %305 : vector<1x64xf32> to vector<64xf32>
    %307 = vector.shape_cast %306 : vector<64xf32> to vector<1x64xf32>
    %308 = vector.broadcast %304 : vector<8x1xf32> to vector<8x64xf32>
    %309 = vector.broadcast %307 : vector<1x64xf32> to vector<8x64xf32>
    %310 = arith.mulf %308, %309 : vector<8x64xf32>
    %311 = arith.addf %303, %310 : vector<8x64xf32>
    %312 = vector.extract_strided_slice %268 {offsets = [0, 3], sizes = [8, 1], strides = [1, 1]} : vector<8x4xf32> to vector<8x1xf32>
    %c3 = arith.constant 3 : index
    %c0_99 = arith.constant 0 : index
    %313 = vector.load %arg24[%c3, %c0_99] : memref<4x64xf32, #tpu.memory_space<vmem>>, vector<1x64xf32>
    %314 = vector.shape_cast %313 : vector<1x64xf32> to vector<64xf32>
    %315 = vector.shape_cast %314 : vector<64xf32> to vector<1x64xf32>
    %316 = vector.broadcast %312 : vector<8x1xf32> to vector<8x64xf32>
    %317 = vector.broadcast %315 : vector<1x64xf32> to vector<8x64xf32>
    %318 = arith.mulf %316, %317 : vector<8x64xf32>
    %319 = arith.addf %311, %318 : vector<8x64xf32>
    %320 = arith.addf %288, %319 : vector<8x64xf32>
    %321 = arith.addf %320, %231 : vector<8x64xf32>
    %c0_100 = arith.constant 0 : index
    %c0_101 = arith.constant 0 : index
    %322 = vector.load %arg27[%c0_100, %c0_101] : memref<1x64xf32, #tpu.memory_space<vmem>>, vector<1x64xf32>
    %323 = vector.shape_cast %322 : vector<1x64xf32> to vector<64xf32>
    %c0_102 = arith.constant 0 : index
    %c0_103 = arith.constant 0 : index
    %324 = vector.load %arg28[%c0_102, %c0_103] : memref<1x64xf32, #tpu.memory_space<vmem>>, vector<1x64xf32>
    %325 = vector.shape_cast %324 : vector<1x64xf32> to vector<64xf32>
    %cst_104 = arith.constant dense<0.000000e+00> : vector<8xf32>
    %326 = vector.multi_reduction <add>, %321, %cst_104 [1] : vector<8x64xf32> to vector<8xf32>
    %327 = vector.shape_cast %326 : vector<8xf32> to vector<8x1xf32>
    %cst_105 = arith.constant 6.400000e+01 : f32
    %328 = vector.broadcast %cst_105 : f32 to vector<8x1xf32>
    %329 = arith.divf %327, %328 : vector<8x1xf32>
    %330 = vector.broadcast %329 : vector<8x1xf32> to vector<8x64xf32>
    %331 = arith.subf %321, %330 : vector<8x64xf32>
    %332 = arith.mulf %331, %331 : vector<8x64xf32>
    %cst_106 = arith.constant dense<0.000000e+00> : vector<8xf32>
    %333 = vector.multi_reduction <add>, %332, %cst_106 [1] : vector<8x64xf32> to vector<8xf32>
    %334 = vector.shape_cast %333 : vector<8xf32> to vector<8x1xf32>
    %cst_107 = arith.constant 6.400000e+01 : f32
    %335 = vector.broadcast %cst_107 : f32 to vector<8x1xf32>
    %336 = arith.divf %334, %335 : vector<8x1xf32>
    %337 = vector.broadcast %329 : vector<8x1xf32> to vector<8x64xf32>
    %338 = arith.subf %321, %337 : vector<8x64xf32>
    %cst_108 = arith.constant 9.99999996E-13 : f32
    %339 = vector.broadcast %cst_108 : f32 to vector<8x1xf32>
    %340 = arith.addf %336, %339 : vector<8x1xf32>
    %341 = math.rsqrt %340 : vector<8x1xf32>
    %342 = vector.broadcast %341 : vector<8x1xf32> to vector<8x64xf32>
    %343 = arith.mulf %338, %342 : vector<8x64xf32>
    %344 = vector.shape_cast %323 : vector<64xf32> to vector<1x64xf32>
    %345 = vector.broadcast %344 : vector<1x64xf32> to vector<8x64xf32>
    %346 = arith.mulf %343, %345 : vector<8x64xf32>
    %347 = vector.shape_cast %325 : vector<64xf32> to vector<1x64xf32>
    %348 = vector.broadcast %347 : vector<1x64xf32> to vector<8x64xf32>
    %349 = arith.addf %346, %348 : vector<8x64xf32>
    %350 = vector.shape_cast %349 : vector<8x64xf32> to vector<1x8x64xf32>
    %c0_109 = arith.constant 0 : index
    %c0_110 = arith.constant 0 : index
    %c0_111 = arith.constant 0 : index
    %351 = vector.load %arg30[%c0_109, %c0_110, %c0_111] : memref<1x8x64xf32, #tpu.memory_space<vmem>>, vector<1x8x64xf32>
    tpu.vector_store %arg30[%c0_109, %c0_110, %c0_111], %350 {strides = array<i32>} : memref<1x8x64xf32, #tpu.memory_space<vmem>>, vector<1x8x64xf32>,
    return
  }
  func.func @transform_0(%arg0: i32) -> (i32, i32, i32) {
    %c0_i32 = arith.constant 0 : i32
    %c0_i32_0 = arith.constant 0 : i32
    %c0_i32_1 = arith.constant 0 : i32
    return %arg0, %c0_i32, %c0_i32_0 : i32, i32, i32
  }
  func.func @transform_1(%arg0: i32) -> (i32, i32, i32) {
    %c0_i32 = arith.constant 0 : i32
    %c0_i32_0 = arith.constant 0 : i32
    %c0_i32_1 = arith.constant 0 : i32
    return %arg0, %c0_i32, %c0_i32_0 : i32, i32, i32
  }
  func.func @transform_2(%arg0: i32) -> (i32, i32) {
    %c0_i32 = arith.constant 0 : i32
    %c0_i32_0 = arith.constant 0 : i32
    %c0_i32_1 = arith.constant 0 : i32
    return %c0_i32, %c0_i32_0 : i32, i32
  }
  func.func @transform_3(%arg0: i32) -> (i32, i32) {
    %c0_i32 = arith.constant 0 : i32
    %c0_i32_0 = arith.constant 0 : i32
    %c0_i32_1 = arith.constant 0 : i32
    return %c0_i32, %c0_i32_0 : i32, i32
  }
  func.func @transform_4(%arg0: i32) -> (i32, i32) {
    %c0_i32 = arith.constant 0 : i32
    %c0_i32_0 = arith.constant 0 : i32
    %c0_i32_1 = arith.constant 0 : i32
    return %c0_i32, %c0_i32_0 : i32, i32
  }
  func.func @transform_5(%arg0: i32) -> (i32, i32) {
    %c0_i32 = arith.constant 0 : i32
    %c0_i32_0 = arith.constant 0 : i32
    %c0_i32_1 = arith.constant 0 : i32
    return %c0_i32, %c0_i32_0 : i32, i32
  }
  func.func @transform_6(%arg0: i32) -> (i32, i32) {
    %c0_i32 = arith.constant 0 : i32
    %c0_i32_0 = arith.constant 0 : i32
    %c0_i32_1 = arith.constant 0 : i32
    return %c0_i32, %c0_i32_0 : i32, i32
  }
  func.func @transform_7(%arg0: i32) -> (i32, i32) {
    %c0_i32 = arith.constant 0 : i32
    %c0_i32_0 = arith.constant 0 : i32
    %c0_i32_1 = arith.constant 0 : i32
    return %c0_i32, %c0_i32_0 : i32, i32
  }
  func.func @transform_8(%arg0: i32) -> (i32, i32) {
    %c0_i32 = arith.constant 0 : i32
    %c0_i32_0 = arith.constant 0 : i32
    %c0_i32_1 = arith.constant 0 : i32
    return %c0_i32, %c0_i32_0 : i32, i32
  }
  func.func @transform_9(%arg0: i32) -> (i32, i32) {
    %c0_i32 = arith.constant 0 : i32
    %c0_i32_0 = arith.constant 0 : i32
    %c0_i32_1 = arith.constant 0 : i32
    return %c0_i32, %c0_i32_0 : i32, i32
  }
  func.func @transform_10(%arg0: i32) -> (i32, i32) {
    %c0_i32 = arith.constant 0 : i32
    %c0_i32_0 = arith.constant 0 : i32
    %c0_i32_1 = arith.constant 0 : i32
    return %c0_i32, %c0_i32_0 : i32, i32
  }
  func.func @transform_11(%arg0: i32) -> (i32, i32) {
    %c0_i32 = arith.constant 0 : i32
    %c0_i32_0 = arith.constant 0 : i32
    %c0_i32_1 = arith.constant 0 : i32
    return %c0_i32, %c0_i32_0 : i32, i32
  }
  func.func @transform_12(%arg0: i32) -> (i32, i32) {
    %c0_i32 = arith.constant 0 : i32
    %c0_i32_0 = arith.constant 0 : i32
    %c0_i32_1 = arith.constant 0 : i32
    return %c0_i32, %c0_i32_0 : i32, i32
  }
  func.func @transform_13(%arg0: i32) -> (i32, i32) {
    %c0_i32 = arith.constant 0 : i32
    %c0_i32_0 = arith.constant 0 : i32
    %c0_i32_1 = arith.constant 0 : i32
    return %c0_i32, %c0_i32_0 : i32, i32
  }
  func.func @transform_14(%arg0: i32) -> (i32, i32) {
    %c0_i32 = arith.constant 0 : i32
    %c0_i32_0 = arith.constant 0 : i32
    %c0_i32_1 = arith.constant 0 : i32
    return %c0_i32, %c0_i32_0 : i32, i32
  }
  func.func @transform_15(%arg0: i32) -> (i32, i32) {
    %c0_i32 = arith.constant 0 : i32
    %c0_i32_0 = arith.constant 0 : i32
    %c0_i32_1 = arith.constant 0 : i32
    return %c0_i32, %c0_i32_0 : i32, i32
  }
  func.func @transform_16(%arg0: i32) -> (i32, i32) {
    %c0_i32 = arith.constant 0 : i32
    %c0_i32_0 = arith.constant 0 : i32
    %c0_i32_1 = arith.constant 0 : i32
    return %c0_i32, %c0_i32_0 : i32, i32
  }
  func.func @transform_17(%arg0: i32) -> (i32, i32) {
    %c0_i32 = arith.constant 0 : i32
    %c0_i32_0 = arith.constant 0 : i32
    %c0_i32_1 = arith.constant 0 : i32
    return %c0_i32, %c0_i32_0 : i32, i32
  }
  func.func @transform_18(%arg0: i32) -> (i32, i32) {
    %c0_i32 = arith.constant 0 : i32
    %c0_i32_0 = arith.constant 0 : i32
    %c0_i32_1 = arith.constant 0 : i32
    return %c0_i32, %c0_i32_0 : i32, i32
  }
  func.func @transform_19(%arg0: i32) -> (i32, i32) {
    %c0_i32 = arith.constant 0 : i32
    %c0_i32_0 = arith.constant 0 : i32
    %c0_i32_1 = arith.constant 0 : i32
    return %c0_i32, %c0_i32_0 : i32, i32
  }
  func.func @transform_20(%arg0: i32) -> (i32, i32) {
    %c0_i32 = arith.constant 0 : i32
    %c0_i32_0 = arith.constant 0 : i32
    %c0_i32_1 = arith.constant 0 : i32
    return %c0_i32, %c0_i32_0 : i32, i32
  }
  func.func @transform_21(%arg0: i32) -> (i32, i32) {
    %c0_i32 = arith.constant 0 : i32
    %c0_i32_0 = arith.constant 0 : i32
    %c0_i32_1 = arith.constant 0 : i32
    return %c0_i32, %c0_i32_0 : i32, i32
  }
  func.func @transform_22(%arg0: i32) -> (i32, i32) {
    %c0_i32 = arith.constant 0 : i32
    %c0_i32_0 = arith.constant 0 : i32
    %c0_i32_1 = arith.constant 0 : i32
    return %c0_i32, %c0_i32_0 : i32, i32
  }
  func.func @transform_23(%arg0: i32) -> (i32, i32) {
    %c0_i32 = arith.constant 0 : i32
    %c0_i32_0 = arith.constant 0 : i32
    %c0_i32_1 = arith.constant 0 : i32
    return %c0_i32, %c0_i32_0 : i32, i32
  }
  func.func @transform_24(%arg0: i32) -> (i32, i32) {
    %c0_i32 = arith.constant 0 : i32
    %c0_i32_0 = arith.constant 0 : i32
    %c0_i32_1 = arith.constant 0 : i32
    return %c0_i32, %c0_i32_0 : i32, i32
  }
  func.func @transform_25(%arg0: i32) -> (i32, i32) {
    %c0_i32 = arith.constant 0 : i32
    %c0_i32_0 = arith.constant 0 : i32
    %c0_i32_1 = arith.constant 0 : i32
    return %c0_i32, %c0_i32_0 : i32, i32
  }
  func.func @transform_26(%arg0: i32) -> (i32, i32) {
    %c0_i32 = arith.constant 0 : i32
    %c0_i32_0 = arith.constant 0 : i32
    %c0_i32_1 = arith.constant 0 : i32
    return %c0_i32, %c0_i32_0 : i32, i32
  }
  func.func @transform_27(%arg0: i32) -> (i32, i32) {
    %c0_i32 = arith.constant 0 : i32
    %c0_i32_0 = arith.constant 0 : i32
    %c0_i32_1 = arith.constant 0 : i32
    return %c0_i32, %c0_i32_0 : i32, i32
  }
  func.func @transform_28(%arg0: i32) -> (i32, i32, i32) {
    %c0_i32 = arith.constant 0 : i32
    %c0_i32_0 = arith.constant 0 : i32
    %c0_i32_1 = arith.constant 0 : i32
    return %arg0, %c0_i32, %c0_i32_0 : i32, i32, i32
  }
  func.func @transform_29(%arg0: i32) -> (i32, i32, i32) {
    %c0_i32 = arith.constant 0 : i32
    %c0_i32_0 = arith.constant 0 : i32
    %c0_i32_1 = arith.constant 0 : i32
    return %arg0, %c0_i32, %c0_i32_0 : i32, i32, i32
  }
}

</mosaic_0001>

<bundles_post_ra>
// kernel: tpu_custom_call.1
= control target key start
LH: loop header
LB: loop body
LE: loop exit
PB: predicated region body
PF: predicated region fallthrough
CT: control target
= control target key end

     0   :  { %s4640_s6 = smov 1   ;;  %s4641_s10 = smov 2   ;;  %s5417_s0 = inlined_call_operand.smem [shape: u32[30], index: -1, kind: input, shape index: {}] }
   0x1   :  { %s4687_s5 = sld [smem:[%s5417_s0]]   ;;  %s4642_s14 = smov 3  }
   0x2   :  { %s4692_s9 = sld [smem:[%s5417_s0 + %s4640_s6]]   ;;  %s4643_s18 = smov 4  }
   0x3   :  { %s4697_s13 = sld [smem:[%s5417_s0 + %s4641_s10]]   ;;  %s4644_s22 = smov 5  }
   0x4   :  { %s4702_s17 = sld [smem:[%s5417_s0 + %s4642_s14]]   ;;  %s4645_s26 = smov 6  }
   0x5   :  { %s4707_s21 = sld [smem:[%s5417_s0 + %s4643_s18]]   ;;  %s4646_s30 = smov 7  }
   0x6   :  { %s4712_s25 = sld [smem:[%s5417_s0 + %s4644_s22]]   ;;  %s4647_s4 = smov 8  }
   0x7   :  { %5434 = sst [smem:[#allocation8_spill]] %s4687_s5  ;;  %s4648_s10 = smov 9  }
   0x8   :  { %5435 = sst [smem:[#allocation9_spill]] %s4692_s9  ;;  %s4649_s15 = smov 10  }
   0x9   :  { %5436 = sst [smem:[#allocation10_spill]] %s4697_s13  ;;  %s4650_s20 = smov 11  }
   0xa   :  { %s4717_s29 = sld [smem:[%s5417_s0 + %s4645_s26]]   ;;  %s4651_s26 = smov 12  }
   0xb   :  { %s4722_s3 = sld [smem:[%s5417_s0 + %s4646_s30]]   ;;  %s4652_s1 = smov 13  }
   0xc   :  { %s4727_s8 = sld [smem:[%s5417_s0 + %s4647_s4]]   ;;  %s4653_s7 = smov 14  }
   0xd   :  { %s4732_s14 = sld [smem:[%s5417_s0 + %s4648_s10]]   ;;  %s4655_s22 = smov 16  }
   0xe   :  { %s4737_s19 = sld [smem:[%s5417_s0 + %s4649_s15]]   ;;  %s4654_s15 = smov 15  }
   0xf   :  { %s4742_s24 = sld [smem:[%s5417_s0 + %s4650_s20]]   ;;  %s4656_s28 = smov 17  }
  0x10   :  { %s4747_s30 = sld [smem:[%s5417_s0 + %s4651_s26]]  }
  0x11   :  { %5437 = sst [smem:[#allocation11_spill]] %s4722_s3 }
  0x12   :  { %5438 = sst [smem:[#allocation12_spill]] %s4727_s8 }
  0x13   :  { %5439 = sst [smem:[#allocation13_spill]] %s4732_s14 }
  0x14   :  { %s4752_s6 = sld [smem:[%s5417_s0 + %s4652_s1]]  }
  0x15   :  { %s4757_s12 = sld [smem:[%s5417_s0 + %s4653_s7]]   ;;  %s4657_s7 = smov 18  }
  0x16   :  { %s4762_s20 = sld [smem:[%s5417_s0 + %s4654_s15]]   ;;  %s4658_s15 = smov 19  }
  0x17   :  { %s4767_s27 = sld [smem:[%s5417_s0 + %s4655_s22]]   ;;  %s4659_s22 = smov 20  }
  0x18   :  { %s4772_s4 = sld [smem:[%s5417_s0 + %s4656_s28]]   ;;  %s4660_s28 = smov 21  }
  0x1a   :  { %5440 = sst [smem:[#allocation14_spill]] %s4752_s6 }
  0x1b   :  { %5441 = sst [smem:[#allocation15_spill]] %s4757_s12 }
  0x1c   :  { %5442 = sst [smem:[#allocation16_spill]] %s4762_s20 }
  0x1d   :  { %5443 = sst [smem:[#allocation17_spill]] %s4767_s27 }
  0x1e   :  { %5444 = sst [smem:[#allocation18_spill]] %s4772_s4 }
  0x1f   :  { %s4777_s6 = sld [smem:[%s5417_s0 + %s4657_s7]]   ;;  %s4661_s7 = smov 22  }
  0x20   :  { %s4782_s20 = sld [smem:[%s5417_s0 + %s4658_s15]]   ;;  %s4662_s15 = smov 23  }
  0x21   :  { %s4787_s27 = sld [smem:[%s5417_s0 + %s4659_s22]]   ;;  %s4663_s22 = smov 24  }
  0x22   :  { %s4792_s4 = sld [smem:[%s5417_s0 + %s4660_s28]]   ;;  %s4664_s28 = smov 25  }
  0x25   :  { %5445 = sst [smem:[#allocation19_spill]] %s4777_s6 }
  0x26   :  { %5446 = sst [smem:[#allocation20_spill]] %s4782_s20 }
  0x27   :  { %5447 = sst [smem:[#allocation21_spill]] %s4787_s27 }
  0x28   :  { %5448 = sst [smem:[#allocation22_spill]] %s4792_s4 }
  0x29   :  { %s4797_s6 = sld [smem:[%s5417_s0 + %s4661_s7]]   ;;  %s4665_s7 = smov 26  }
  0x2a   :  { %s4802_s20 = sld [smem:[%s5417_s0 + %s4662_s15]]   ;;  %s4666_s15 = smov 27  }
  0x2b   :  { %s4807_s27 = sld [smem:[%s5417_s0 + %s4663_s22]]   ;;  %s4667_s22 = smov 28  }
  0x2c   :  { %s4812_s4 = sld [smem:[%s5417_s0 + %s4664_s28]]   ;;  %s4668_s28 = smov 29  }
  0x2f   :  { %5449 = sst [smem:[#allocation23_spill]] %s4797_s6 }
  0x30   :  { %5450 = sst [smem:[#allocation24_spill]] %s4802_s20 }
  0x31   :  { %5451 = sst [smem:[#allocation25_spill]] %s4807_s27 }
  0x32   :  { %5452 = sst [smem:[#allocation26_spill]] %s4812_s4 }
  0x33   :  { %s4817_s6 = sld [smem:[%s5417_s0 + %s4665_s7]]  }
  0x34   :  { %s4822_s20 = sld [smem:[%s5417_s0 + %s4666_s15]]  }
  0x35   :  { %s4827_s27 = sld [smem:[%s5417_s0 + %s4667_s22]]  }
  0x36   :  { %s4832_s4 = sld [smem:[%s5417_s0 + %s4668_s28]]  }
  0x37   :  { %65 = vsyncpa [#allocation3], 0 }
  0x38   :  { %67 = vsyncpa [#allocation3 + $0x1], 0 }
  0x39   :  { %68 = vsyncpa [#allocation5], 0 }
  0x3a   :  { %70 = vsyncpa [#allocation5 + $0x1], 0  ;;  %s4834_s7 = smov 0   ;;  %s4836_s10 = smov 0  }
  0x3b   :  { %s4838_s11 = smov 0   ;;  %s4840_s15 = smov 0  }
  0x3c LB: > { %s5453_s13 = sld [smem:[#allocation10_spill]]  ;;  %s5454_s12 = sld [smem:[#allocation15_spill]]  ;;  %s4634_s11 = sphi %s4838_s11, %s5479_s11   ;;  %s4630_s10 = sphi %s4836_s10, %s5478_s10   ;;  %s4626_s7 = sphi %s4834_s7, %s5477_s7   ;;  %s4638_s15 = sphi %s4840_s15, %s5480_s15  }
  0x3d   : > { %s5455_s8 = sld [smem:[#allocation12_spill]]  ;;  %s4855_s0 = sadd.s32 4294967295, %s4638_s15  }
  0x3e   : > { %s3809_s16 = sadd.s32 4294967294, %s4638_s15   ;;  %s4859_s18 = sadd.s32 1, %s4638_s15  }
  0x3f   : > { %s681_s22 = sadd.s32 1, %s4634_s11  ;;  %s678_s23 = ssub.s32 %s4638_s15, %s4859_s18 }
  0x40   : > { %p691_p0 = scmp.ne.s32.totalorder %s4634_s11, %s4630_s10  ;;  %p679_p1 = scmp.eq.s32.totalorder %s678_s23, 0 }
  0x41   : > { %p692_p2 = scmp.eq.s32.totalorder %s4855_s0, 1  ;;  %p697_p3 = scmp.ne.s32.totalorder %s4630_s10, %s4626_s7 }
  0x42   : > { %p698_p4 = scmp.eq.s32.totalorder %s3809_s16, 1  ;;  %p3812_p7 = scmp.ge.s32.totalorder %s4638_s15, 1 }
  0x43   : > { %s4870_s26 = scalar_select %p679_p1, %s4634_s11, %s681_s22  }
  0x44   : > { %p4872_p5 = por %p692_p2, %p691_p0  ;;  %p4876_p6 = por %p698_p4, %p697_p3 }
  0x45   : > { %p834_p8 = scmp.lt.s32.totalorder %s4638_s15, 3 }
  0x47   : > { %p835_p9 = pnand %p3812_p7, %p834_p8 }
  0x48   : > { %v4360_v0 = vld [vmem:[%s5453_s13 + $0x4] ss:$12 sps:$4 sm:$0xff] (!%p835_p9)   ;;  %s5458_s5 = sld [smem:[#allocation8_spill]] (!%p835_p9)  ;;  %p918_p10 = scmp.lt.s32.totalorder (!%p835_p9), %s4855_s0, 1  ;;  %v4362_v1 = vld [vmem:[%s5453_s13] ss:$12 sps:$4 sm:$0xff] (!%p835_p9)   ;;  %v948_v16 = vlaneseq (!%p835_p9) }
  0x49   : > { %838 = sbr.rel (%p835_p9) target bundleno = 5603 (0x15e3), region = 132  ;;  %v4669_v2 = vmov (!%p835_p9), 0   ;;  %1031 = vmatprep.subr.bf16.mxu0 (!%p835_p9), %v4360_v0  ;;  %v4363_v3 = vld [vmem:[%s5453_s13 + $0x1c] ss:$12 sps:$4 sm:$0xff] (!%p835_p9)   ;;  %v4365_v4 = vld [vmem:[%s5453_s13 + $0x18] ss:$12 sps:$4 sm:$0xff] (!%p835_p9)  }
  0x4a   : > { %1063 = vmatprep.mubr.bf16.mxu0 (!%p835_p9), %v4669_v2  ;;  %4355 = vset.pattern.permute.xlu0 (!%p835_p9), %v4669_v2  ;;  %v4366_v5 = vld [vmem:[%s5453_s13 + $0x34] ss:$12 sps:$4 sm:$0xff] (!%p835_p9)   ;;  %v4368_v6 = vld [vmem:[%s5453_s13 + $0x30] ss:$12 sps:$4 sm:$0xff] (!%p835_p9)   ;;  %v4369_v7 = vld [vmem:[%s5453_s13 + $0x4c] ss:$12 sps:$4 sm:$0xff] (!%p835_p9)  }
  0x4b   : > { %1032 = vmatpush1.bf16.msra.mxu0 (!%p835_p9), %v4362_v1  ;;  %v4371_v8 = vld [vmem:[%s5453_s13 + $0x48] ss:$12 sps:$4 sm:$0xff] (!%p835_p9)   ;;  %vm1027_vm0 = vcmask (!%p835_p9), 523264   ;;  %v4670_v11 = vmov (!%p835_p9), 0.0   ;;  %vm4671_vm1 = vmmov (!%p835_p9), 0   ;;  %v4922_v17 = vshrl.u32 (!%p835_p9), %v948_v16, 7 }
  0x4c   : > { %1033 = vmatprep.subr.bf16.mxu0 (!%p835_p9), %v4363_v3  ;;  %4166 = vmatprep.subr.bf16.mxu1 (!%p835_p9), %v4670_v11  ;;  %v4372_v12 = vld [vmem:[%s5453_s13 + $0x8] ss:$12 sps:$4 sm:$0xff] (!%p835_p9)   ;;  %v4373_v13 = vld [vmem:[%s5453_s13 + $0x20] ss:$12 sps:$4 sm:$0xff] (!%p835_p9)   ;;  %v4374_v14 = vld [vmem:[%s5453_s13 + $0x38] ss:$12 sps:$4 sm:$0xff] (!%p835_p9)  }
  0x4d   : > { %4174 = vmatprep.mubr.msk.bf16.mxu1 (!%p835_p9), %vm4671_vm1, %v4670_v11  ;;  %4167 = vmatpush3.bf16.msra.mxu1 (!%p835_p9), %v4372_v12  ;;  %v4375_v15 = vld [vmem:[%s5453_s13 + $0x50] ss:$12 sps:$4 sm:$0xff] (!%p835_p9)   ;;  %v4925_v18 = vsub.s32 (!%p835_p9), 1, %v4922_v17  ;;  %v946_v19 = vld [vmem:[%s4702_s17] sm:$0x7] (!%p835_p9)  ;;  %v4929_v20 = vsub.s32 (!%p835_p9), 0, %v4922_v17 }
  0x4e   : > { %4168 = vmatprep.subr.bf16.mxu1 (!%p835_p9), %v4670_v11  ;;  %vm1130_vm2 = vcmask (!%p835_p9), 261120   ;;  %s5424_s23 = smov (!%p835_p9), 96   ;;  %v4941_v32 = vsub.s32 (!%p835_p9), 2, %v4922_v17  ;;  %vm1251_vm3 = vcmask (!%p835_p9), 1043456   ;;  %s5459_s9 = sld [smem:[#allocation9_spill]] (!%p835_p9)  ;;  %vm1223_vm4 = vcmask (!%p835_p9), 64512  }
  0x4f   : > { %1034 = vmatpush1.bf16.msra.mxu0 (!%p835_p9), %v4365_v4  ;;  %v955_v21 = vrot.slane (!%p835_p9), %v946_v19, %v4925_v18  ;;  %v951_v24 = vrot.slane (!%p835_p9), %v946_v19, %v4929_v20  ;;  %s5460_s3 = sld [smem:[#allocation11_spill]] (!%p835_p9)  ;;  %s5461_s14 = sld [smem:[#allocation13_spill]] (!%p835_p9)  ;;  %vm2870_vm5 = vcmask (!%p835_p9), 31744  }
  0x50   : > { %s4889_s2 = scalar_select %p918_p10, %s4855_s0, 1  ;;  %1035 = vmatprep.subr.bf16.mxu0 %v4366_v5  ;;  %v959_v33 = vrot.slane %v946_v19, %v4941_v32 }
  0x51   : > { %4169 = vmatpush3.bf16.msra.mxu1 %v4373_v13 }
  0x52   : > { %s3815_s16 = sshll.u32 %s4889_s2, 3  ;;  %4170 = vmatprep.subr.bf16.mxu1 %v4670_v11  ;;  %s5423_s2 = smov 32  }
  0x53   : > { %s921_s22 = scalar_lea.vmem %s5458_s5, %s3815_s16  ;;  %1036 = vmatpush1.bf16.msra.mxu0 %v4368_v6 }
  0x54   : > { %v4900_v9 = vld [vmem:[%s921_s22] sm:$0xff]  ;;  %1037 = vmatprep.subr.bf16.mxu0 %v4369_v7  ;;  %s925_s22 = scalar_lea.vmem %s5459_s9, %s3815_s16  ;;  %s5462_s16 = sld [smem:[#allocation14_spill]] }
  0x55   : > { %v929_v10 = vpack.c.bf16 %v4900_v9, %v4900_v9  ;;  %4171 = vmatpush3.bf16.msra.mxu1 %v4374_v14  ;;  %v4954_v50 = vld [vmem:[%s925_s22] sm:$0xff]  ;;  %s5035_s22 = sand.u32 1, %s4630_s10  }
  0x56   : > { %4172 = vmatprep.subr.bf16.mxu1 %v4670_v11 }
  0x57   : > { %1038 = vmatpush1.bf16.msra.mxu0 %v4371_v8 }
  0x58   : > { %4178 = vmatprep.subr.bf16.mxu0 %v4670_v11 }
  0x59   : > { %4173 = vmatpush3.bf16.msra.mxu1 %v4375_v15 }
  0x5a   : > { %3829 = vmatmul.mubr.msk.bf16.vlgmr.msra.gmra.mrb[0].mxu0 %vm1027_vm0, %v929_v10  ;;  %4184 = vmatprep.subr.bf16.mxu1 %v4670_v11 }
  0x5b   : > { %4180 = vmatprep.mubr.msk.bf16.mxu0 %vm4671_vm1, %v4670_v11 }
  0x5c   : > { %4175 = vmatmul.mubr.msk.bf16.vlgmr.msra.gmra.mrb[0].mxu1 %vm1027_vm0, %v929_v10 }
  0x5d   : > { %4186 = vmatprep.mubr.msk.bf16.mxu1 %vm4671_vm1, %v4670_v11 }
 0x12d   : > { %v1065_v22 = vpop.f32.mrb[0].mxu0 }
 0x12e   : > { %v1067_v23 = vpop.f32.mrb[1].mxu0  ;;  %v1066_v29 = vadd.f32 %v1065_v22, %v951_v24  ;;  %v4376_v22 = vld [vmem:[%s4707_s21] sm:$0xff]   ;;  %v4378_v24 = vld [vmem:[%s4707_s21 + $0x10] sm:$0xff]  }
 0x12f   : > { %v1068_v25 = vadd.f32 %v1067_v23, %v955_v21  ;;  %v1069_v26 = vpop.f32.mrb[2].mxu0  ;;  %v1106_v34 = vpop.f32.mrb[0].mxu1  ;;  %v4377_v23 = vld [vmem:[%s4707_s21 + $0x8] sm:$0xff]  }
 0x130   : > { %v1070_v27 = vpop.f32.mrb[3].mxu0  ;;  %v1116_v31 = vpack.c.bf16 %v1066_v29, %v1066_v29  ;;  %v1107_v35 = vadd.f32 %v1106_v34, %v959_v33  ;;  %v4176_v36 = vpop.f32.mrb[1].mxu1 }
 0x131   : > { %v1122_v28 = vpack.c.bf16 %v1068_v25, %v1068_v25  ;;  %1119 = vrot.lane.b32.xlu0 %v1068_v25, %s5424_s23  ;;  %v1109_v37 = vpop.f32.mrb[2].mxu1  ;;  %v4379_v25 = vld [vmem:[%s4707_s21 + $0x18] sm:$0xff]  }
 0x132   : > { %v1128_v38 = vpack.c.bf16 %v1107_v35, %v1107_v35  ;;  %v4177_v39 = vpop.f32.mrb[3].mxu1 }
 0x133   : > { %v1135_v30 = vsel %vm1130_vm2, %v1122_v28, 0 }
 0x134   : > { %4179 = vmatpush3.bf16.xpose.msra.mxu0 %v1135_v30  ;;  %v1253_v42 = vsel %vm1251_vm3, %v1128_v38, 0  ;;  %v3835_v38 = vld [vmem:[%s4712_s25] ss:$0 sm:$0xff] }
 0x135   : > { %1113 = vrot.lane.b32.xlu0 %v1066_v29, %s5424_s23  ;;  %4190 = vmatprep.subr.bf16.mxu0 %v4670_v11 }
 0x13b   : > { %4181 = vmatmul.mubr.msk.bf16.vlgmr.msra.gmra.mrb[4].mxu0 %vm1130_vm2, %v1116_v31 }
 0x13c   : > { %4192 = vmatprep.mubr.msk.bf16.mxu0 %vm4671_vm1, %v4670_v11  ;;  %4191 = vmatpush3.bf16.msra.mxu0 %v1253_v42 }
 0x13d   : > { %4202 = vmatprep.subr.bf16.mxu0 %v4670_v11 }
 0x1a3   : > { %v1120_v40 = vpop.permute.xlu0 %1119 }
 0x1a4   : > { %v1123_v41 = vpack.c.bf16 %v1120_v40, %v1120_v40 }
 0x1a6   : > { %v1181_v43 = vsel %vm1130_vm2, %v1123_v41, 0 }
 0x1a7   : > { %4185 = vmatpush3.bf16.xpose.msra.mxu1 %v1181_v43  ;;  %v1114_v44 = vpop.permute.xlu0 %1113 }
 0x1a8   : > { %4196 = vmatprep.subr.bf16.mxu1 %v4670_v11  ;;  %v1117_v45 = vpack.c.bf16 %v1114_v44, %v1114_v44 }
 0x1ae   : > { %4187 = vmatmul.mubr.msk.bf16.vlgmr.msra.gmra.mrb[4].mxu1 %vm1130_vm2, %v1117_v45 }
 0x1af   : > { %4198 = vmatprep.mubr.msk.bf16.mxu1 %vm4671_vm1, %v4670_v11 }
 0x20e   : > { %v1171_v46 = vpop.f32.mrb[4].mxu0 }
 0x20f   : > { %v4182_v47 = vpop.f32.mrb[5].mxu0  ;;  %v1172_v55 = vadd.f32 %v1171_v46, %v4954_v50 }
 0x210   : > { %v1174_v48 = vpop.f32.mrb[6].mxu0 }
 0x211   : > { %v4183_v49 = vpop.f32.mrb[7].mxu0  ;;  %v1224_v58 = vsel %vm1223_vm4, %v1172_v55, -inf }
 0x281   : > { %v1217_v51 = vpop.f32.mrb[4].mxu1 }
 0x282   : > { %v1218_v52 = vadd.f32 %v1217_v51, %v4954_v50  ;;  %v4188_v53 = vpop.f32.mrb[5].mxu1 }
 0x283   : > { %v1220_v54 = vpop.f32.mrb[6].mxu1  ;;  %v4380_v53 = vld [vmem:[%s5455_s8] ss:$8 sps:$4 sm:$0xff]  }
 0x284   : > { %v4189_v56 = vpop.f32.mrb[7].mxu1  ;;  %v1227_v57 = vsel %vm1223_vm4, %v1218_v52, -inf  ;;  %v4385_v54 = vld [vmem:[%s5455_s8 + $0x14] ss:$8 sps:$4 sm:$0xff]  }
 0x285   : > { %1228 = vmax.xlane.f32.xlu1 %v1227_v57  ;;  %v4386_v56 = vld [vmem:[%s5455_s8 + $0x20] ss:$8 sps:$4 sm:$0xff]   ;;  %v4389_v57 = vld [vmem:[%s5455_s8 + $0x30] ss:$8 sps:$4 sm:$0xff]  }
 0x289   : > { %1225 = vmax.xlane.f32.xlu1 %v1224_v58  ;;  %v4391_v58 = vld [vmem:[%s5455_s8 + $0x34] ss:$8 sps:$4 sm:$0xff]  }
 0x29a   : > { %1125 = vrot.lane.b32.xlu1 %v1107_v35, %s5424_s23 }
 0x312   : > { %v1229_v59 = vpop.xlane.xlu1 %1228 }
 0x313   : > { %v1231_v60 = vsub.f32 %v1218_v52, %v1229_v59  ;;  %v4382_v52 = vld [vmem:[%s5455_s8 + $0x4] ss:$8 sps:$4 sm:$0xff]  }
 0x315   : > { %v1234_v61 = vmul.f32 1.442695, %v1231_v60 }
 0x316   : > { %v1226_v62 = vpop.xlane.xlu1 %1225 }
 0x317   : > { %4496 = vpow2.f32 %v1234_v61  ;;  %v1230_v63 = vsub.f32 %v1172_v55, %v1226_v62  ;;  %v4388_v55 = vld [vmem:[%s5455_s8 + $0x24] ss:$8 sps:$4 sm:$0xff]  }
 0x319   : > { %v1232_v0 = vmul.f32 1.442695, %v1230_v63  ;;  %v3841_v63 = vld [vmem:[%s4717_s29] ss:$0 sm:$0xff] }
 0x31a   : > { %v1126_v1 = vpop.permute.xlu1 %1125 }
 0x31b   : > { %4498 = vpow2.f32 %v1232_v0  ;;  %v1129_v3 = vpack.c.bf16 %v1126_v1, %v1126_v1  ;;  %v3842_v1 = vld [vmem:[%s5460_s3] ss:$0 sm:$0xff]  ;;  %s5463_s3 = sld [smem:[#allocation16_spill]] }
 0x31d   : > { %v1299_v4 = vsel %vm1251_vm3, %v1129_v3, 0 }
 0x31e   : > { %4197 = vmatpush3.bf16.msra.mxu1 %v1299_v4 }
 0x31f   : > { %1524 = vmatprep.subr.bf16.mxu1 %v4382_v52 }
 0x321   : > { %v4497_v5 = vpop.eup %4496 }
 0x322   : > { %v1239_v6 = vsel %vm1223_vm4, %v4497_v5, 0.0 }
 0x323   : > { %1240 = vadd.xlane.f32.xlu0 %v1239_v6  ;;  %v4392_v6 = vld [vmem:[%s4737_s19 + $0x40] sm:$0xff]  }
 0x325   : > { %v4499_v7 = vpop.eup %4498 }
 0x326   : > { %v1236_v8 = vsel %vm1223_vm4, %v4499_v7, 0.0 }
 0x327   : > { %1237 = vadd.xlane.f32.xlu1 %v1236_v8  ;;  %v4394_v8 = vld [vmem:[%s4737_s19 + $0x48] sm:$0xff]  }
 0x3b0   : > { %v1241_v10 = vpop.xlane.xlu0 %1240 }
 0x3b1   : > { %4500 = vrcp.f32 %v1241_v10  ;;  %v4395_v10 = vld [vmem:[%s4737_s19 + $0x8] sm:$0xff]  }
 0x3b4   : > { %v1238_v12 = vpop.xlane.xlu1 %1237 }
 0x3b5   : > { %4502 = vrcp.f32 %v1238_v12  ;;  %v4396_v12 = vld [vmem:[%s4737_s19 + $0x50] sm:$0xff]  }
 0x3bb   : > { %v4501_v13 = vpop.eup %4500 }
 0x3bc   : > { %v1245_v14 = vmul.f32 %v4501_v13, %v4497_v5  ;;  %v4397_v13 = vld [vmem:[%s4737_s19 + $0x10] sm:$0xff]  }
 0x3be   : > { %v1247_v15 = vpack.c.bf16 %v1245_v14, %v1245_v14  ;;  %v4398_v14 = vld [vmem:[%s4737_s19 + $0x58] sm:$0xff]  }
 0x3bf   : > { %v4503_v16 = vpop.eup %4502 }
 0x3c0   : > { %v1244_v19 = vmul.f32 %v4503_v16, %v4499_v7  ;;  %4199 = vmatmul.mubr.msk.bf16.vlgmr.msra.gmra.mrb[8].mxu1 %vm1223_vm4, %v1247_v15  ;;  %v4393_v7 = vld [vmem:[%s4737_s19] sm:$0xff]   ;;  %v4399_v15 = vld [vmem:[%s4737_s19 + $0x18] sm:$0xff]  }
 0x3c1   : > { %1556 = vmatprep.mubr.bf16.mxu1 %v4669_v2  ;;  %1525 = vmatpush1.bf16.msra.mxu1 %v4380_v53  ;;  %v4400_v16 = vld [vmem:[%s4737_s19 + $0x60] sm:$0xff]  }
 0x3c2   : > { %v1246_v21 = vpack.c.bf16 %v1244_v19, %v1244_v19  ;;  %1526 = vmatprep.subr.bf16.mxu1 %v4385_v54  ;;  %v4401_v19 = vld [vmem:[%s4737_s19 + $0x20] sm:$0xff]  }
 0x3c4   : > { %4193 = vmatmul.mubr.msk.bf16.vlgmr.msra.gmra.mrb[8].mxu0 %vm1223_vm4, %v1246_v21  ;;  %v4402_v21 = vld [vmem:[%s4737_s19 + $0x68] sm:$0xff]  }
 0x3c5   : > { %4210 = vmatprep.mubr.msk.bf16.mxu0 %vm4671_vm1, %v4670_v11  ;;  %4203 = vmatpush3.bf16.msra.mxu0 %v4376_v22  ;;  %v4403_v22 = vld [vmem:[%s4737_s19 + $0x28] sm:$0xff]  }
 0x3c6   : > { %4204 = vmatprep.subr.bf16.mxu0 %v4670_v11 }
 0x3c9   : > { %4205 = vmatpush3.bf16.msra.mxu0 %v4377_v23  ;;  %v4404_v23 = vld [vmem:[%s4737_s19 + $0x70] sm:$0xff]  }
 0x3ca   : > { %4206 = vmatprep.subr.bf16.mxu0 %v4670_v11 }
 0x3cd   : > { %4207 = vmatpush3.bf16.msra.mxu0 %v4378_v24  ;;  %v4405_v24 = vld [vmem:[%s4737_s19 + $0x30] sm:$0xff]  }
 0x3ce   : > { %4208 = vmatprep.subr.bf16.mxu0 %v4670_v11 }
 0x3d1   : > { %4209 = vmatpush3.bf16.msra.mxu0 %v4379_v25  ;;  %v4406_v25 = vld [vmem:[%s4737_s19 + $0x78] sm:$0xff]  }
 0x3d2   : > { %4033 = vmatprep.subr.bf16.mxu0 %v4392_v6 }
 0x493   : > { %v1335_v26 = vpop.f32.mrb[8].mxu1 }
 0x494   : > { %1342 = vrot.lane.b32.xlu0 %v1335_v26, %s5423_s2  ;;  %v4200_v27 = vpop.f32.mrb[9].mxu1  ;;  %v4407_v26 = vld [vmem:[%s4737_s19 + $0x38] sm:$0xff]   ;;  %s5426_s2 = sshll.u32 %s5035_s22, 3 }
 0x495   : > { %v1338_v28 = vpop.f32.mrb[10].mxu1  ;;  %v1469_v27 = vld [vmem:[%s5461_s14] sm:$0x3]  ;;  %s5047_s23 = scalar_lea.vmem [#allocation2], %s5426_s2  ;;  %s5467_s2 = smov 32  }
 0x496   : > { %v4201_v29 = vpop.f32.mrb[11].mxu1  ;;  %v1474_v28 = vrot.slane %v1469_v27, %v4929_v20  ;;  %s3664_s5 = sshll.u32 %s5047_s23, 4  ;;  %s3665_s5 = int_to_ptr.vmem [resolvable:$true] %s3664_s5 }
 0x497   : > { %v1289_v30 = vpop.f32.mrb[8].mxu0  ;;  %v1478_v29 = vrot.slane %v1469_v27, %v4925_v18  ;;  %v3870_v27 = vld [vmem:[%s5462_s16] ss:$0 sm:$0xff]  ;;  %s5464_s16 = smov 96   ;;  %s4544_s9 = scalar_lea.vmem %s3665_s5, 128 }
 0x498   : > { %v4194_v31 = vpop.f32.mrb[9].mxu0  ;;  %p4545_p11 = scmp.ne.s32.totalorder %s3665_s5, %s4544_s9 }
 0x499   : > { %v1292_v33 = vpop.f32.mrb[10].mxu0 }
 0x49a   : > { %v4195_v34 = vpop.f32.mrb[11].mxu0  ;;  %p4546_p12 = pnand %p4545_p11, %p4872_p5 }
 0x49c   : > { %p4547_p13 = pneg %p4546_p12 }
 0x506   : > { %v1343_v35 = vpop.permute.xlu0 %1342 }
 0x507   : > { %v1345_v36 = vsel %vm1130_vm2, %v1289_v30, %v1343_v35 }
 0x508   : > { %v1346_v37 = vpack.c.bf16 %v1345_v36, %v1345_v36 }
 0x50a   : > { %4211 = vmatmul.mubr.msk.bf16.vlgmr.msra.gmra.mrb[12].mxu0 %vm1027_vm0, %v1346_v37 }
 0x50b   : > { %4034 = vmatpush3.bf16.msra.mxu0 %v4393_v7 }
 0x50c   : > { %4035 = vmatprep.subr.bf16.mxu0 %v4394_v8 }
 0x50f   : > { %4036 = vmatpush3.bf16.msra.mxu0 %v4395_v10  ;;  %v4410_v10 = vld [vmem:[%s5454_s12 + $0x4] ss:$12 sps:$4 sm:$0xff]  }
 0x510   : > { %4037 = vmatprep.subr.bf16.mxu0 %v4396_v12  ;;  %v4408_v12 = vld [vmem:[%s5454_s12] ss:$12 sps:$4 sm:$0xff]  }
 0x513   : > { %4038 = vmatpush3.bf16.msra.mxu0 %v4397_v13  ;;  %v4413_v13 = vld [vmem:[%s5454_s12 + $0x1c] ss:$12 sps:$4 sm:$0xff]  }
 0x514   : > { %4039 = vmatprep.subr.bf16.mxu0 %v4398_v14  ;;  %v4416_v14 = vld [vmem:[%s5454_s12 + $0x34] ss:$12 sps:$4 sm:$0xff]  }
 0x517   : > { %4040 = vmatpush3.bf16.msra.mxu0 %v4399_v15  ;;  %v4414_v15 = vld [vmem:[%s5454_s12 + $0x30] ss:$12 sps:$4 sm:$0xff]  }
 0x518   : > { %4041 = vmatprep.subr.bf16.mxu0 %v4400_v16  ;;  %v4419_v16 = vld [vmem:[%s5454_s12 + $0x4c] ss:$12 sps:$4 sm:$0xff]  }
 0x51b   : > { %4042 = vmatpush3.bf16.msra.mxu0 %v4401_v19  ;;  %v4417_v19 = vld [vmem:[%s5454_s12 + $0x48] ss:$12 sps:$4 sm:$0xff]  }
 0x51c   : > { %4043 = vmatprep.subr.bf16.mxu0 %v4402_v21 }
 0x51f   : > { %4044 = vmatpush3.bf16.msra.mxu0 %v4403_v22 }
 0x520   : > { %4045 = vmatprep.subr.bf16.mxu0 %v4404_v23 }
 0x523   : > { %4046 = vmatpush3.bf16.msra.mxu0 %v4405_v24 }
 0x524   : > { %4047 = vmatprep.subr.bf16.mxu0 %v4406_v25  ;;  %v3869_v25 = vld [vmem:[%s4747_s30] ss:$0 sm:$0xff] }
 0x527   : > { %4048 = vmatpush3.bf16.msra.mxu0 %v4407_v26 }
 0x528   : > { %4226 = vmatprep.subr.bf16.mxu0 %v4670_v11 }
 0x5dd   : > { %v1423_v39 = vpop.f32.mrb[12].mxu0 }
 0x5de   : > { %v1424_v40 = vadd.f32 %v3835_v38, %v1423_v39  ;;  %v4212_v41 = vpop.f32.mrb[13].mxu0 }
 0x5df   : > { %v1426_v42 = vpop.f32.mrb[14].mxu0 }
 0x5e0   : > { %v4213_v43 = vpop.f32.mrb[15].mxu0  ;;  %v1429_v44 = vadd.f32 %v1424_v40, %v4900_v9  ;;  %v4383_v9 = vld [vmem:[%s5455_s8 + $0x10] ss:$8 sps:$4 sm:$0xff]   ;;  %s3646_s8 = scalar_lea.sflag [#allocation3], %s5035_s22 }
 0x5e1   : > { %1527 = vmatpush1.bf16.msra.mxu1 %v4383_v9 }
 0x5e2   : > { %v1432_v45 = vsel %vm1027_vm0, %v1429_v44, 0.0  ;;  %1528 = vmatprep.subr.bf16.mxu1 %v4388_v55 }
 0x5e3   : > { %1433 = vadd.xlane.f32.xlu0 %v1432_v45 }
 0x5e5   : > { %1529 = vmatpush1.bf16.msra.mxu1 %v4386_v56 }
 0x5e6   : > { %1530 = vmatprep.subr.bf16.mxu1 %v4391_v58  ;;  %v3852_v58 = vld [vmem:[%s4742_s24] ss:$0 sm:$0xff] }
 0x5e9   : > { %1531 = vmatpush1.bf16.msra.mxu1 %v4389_v57 }
 0x5ea   : > { %1892 = vmatprep.subr.bf16.mxu1 %v4410_v10 }
 0x670   : > { %v1434_v46 = vpop.xlane.xlu0 %1433 }
 0x671   : > { %v1436_v47 = vmul.f32 0.015625, %v1434_v46 }
 0x673   : > { %v1437_v48 = vsub.f32 %v1429_v44, %v1436_v47 }
 0x675   : > { %v1438_v49 = vmul.f32 %v1437_v48, %v1437_v48 }
 0x677   : > { %v1439_v51 = vsel %vm1027_vm0, %v1438_v49, 0.0 }
 0x678   : > { %1440 = vadd.xlane.f32.xlu1 %v1439_v51 }
 0x705   : > { %v1441_v59 = vpop.xlane.xlu1 %1440 }
 0x706   : > { %v1442_v60 = vmul.f32 0.015625, %v1441_v59 }
 0x708   : > { %v1443_v61 = vadd.f32 1e-12, %v1442_v60 }
 0x70a   : > { %4504 = vrsqrt.f32 %v1443_v61 }
 0x714   : > { %v4505_v62 = vpop.eup %4504 }
 0x715   : > { %v1445_v0 = vmul.f32 %v4505_v62, %v1437_v48 }
 0x717   : > { %v1452_v3 = vmul.f32 %v3841_v63, %v1445_v0 }
 0x719   : > { %v4993_v4 = vadd.f32 %v3842_v1, %v1452_v3 }
 0x71b   : > { %v1460_v5 = vpack.c.bf16 %v4993_v4, %v4993_v4 }
 0x71d   : > { %3851 = vmatmul.mubr.msk.bf16.vlgmr.msra.gmra.mrb[12].mxu1 %vm1027_vm0, %v1460_v5 }
 0x71e   : > { %1924 = vmatprep.mubr.bf16.mxu1 %v4669_v2  ;;  %1893 = vmatpush1.bf16.msra.mxu1 %v4408_v12 }
 0x71f   : > { %1894 = vmatprep.subr.bf16.mxu1 %v4413_v13 }
 0x7f0   : > { %v1558_v30 = vpop.f32.mrb[12].mxu1 }
 0x7f1   : > { %v1559_v31 = vadd.f32 %v1558_v30, %v1474_v28  ;;  %v1560_v33 = vpop.f32.mrb[13].mxu1  ;;  %v4420_v30 = vld [vmem:[%s5454_s12 + $0x8] ss:$12 sps:$4 sm:$0xff]  }
 0x7f2   : > { %v1561_v34 = vadd.f32 %v1560_v33, %v1478_v29  ;;  %v1562_v35 = vpop.f32.mrb[14].mxu1  ;;  %v4421_v33 = vld [vmem:[%s5454_s12 + $0x20] ss:$12 sps:$4 sm:$0xff]  }
 0x7f3   : > { %v1567_v36 = vmul.f32 0.044715, %v1559_v31  ;;  %v1563_v37 = vpop.f32.mrb[15].mxu1  ;;  %v1565_v49 = vmul.f32 0.5, %v1559_v31  ;;  %v4423_v35 = vld [vmem:[%s5454_s12 + $0x50] ss:$12 sps:$4 sm:$0xff]  }
 0x7f4   : > { %v1568_v38 = vmul.f32 0.044715, %v1561_v34  ;;  %v1566_v52 = vmul.f32 0.5, %v1561_v34 }
 0x7f5   : > { %v1569_v39 = vmul.f32 %v1567_v36, %v1559_v31  ;;  %v1808_v36 = vld [vmem:[%s5463_s3] sm:$0x7]  ;;  %s5465_s3 = sld [smem:[#allocation17_spill]] }
 0x7f6   : > { %v1570_v40 = vmul.f32 %v1568_v38, %v1561_v34  ;;  %v1817_v37 = vrot.slane %v1808_v36, %v4925_v18 }
 0x7f7   : > { %v1571_v41 = vmul.f32 %v1569_v39, %v1559_v31 }
 0x7f8   : > { %v1572_v42 = vmul.f32 %v1570_v40, %v1561_v34  ;;  %v1813_v40 = vrot.slane %v1808_v36, %v4929_v20 }
 0x7f9   : > { %v1573_v43 = vadd.f32 %v1571_v41, %v1559_v31 }
 0x7fa   : > { %v1574_v44 = vadd.f32 %v1572_v42, %v1561_v34  ;;  %v4422_v34 = vld [vmem:[%s5454_s12 + $0x38] ss:$12 sps:$4 sm:$0xff]  }
 0x7fb   : > { %v1575_v45 = vmul.f32 0.7978846, %v1573_v43 }
 0x7fc   : > { %v1576_v46 = vmul.f32 0.7978846, %v1574_v44 }
 0x7fd   : > { %4506 = vtanh.f32 %v1575_v45 }
 0x7fe   : > { %4508 = vtanh.f32 %v1576_v46 }
 0x807   : > { %v4507_v47 = vpop.eup %4506 }
 0x808   : > { %v4509_v48 = vpop.eup %4508  ;;  %v1579_v51 = vadd.f32 1.0, %v4507_v47 }
 0x809   : > { %v1580_v53 = vadd.f32 1.0, %v4509_v48  ;;  %v1821_v48 = vrot.slane %v1808_v36, %v4941_v32 }
 0x80a   : > { %v1581_v54 = vmul.f32 %v1579_v51, %v1565_v49 }
 0x80b   : > { %v1582_v9 = vmul.f32 %v1580_v53, %v1566_v52 }
 0x80c   : > { %v1583_v56 = vpack.c.bf16 %v1581_v54, %v1581_v54 }
 0x80d   : > { %v1584_v55 = vpack.c.bf16 %v1582_v9, %v1582_v9 }
 0x80f   : > { %1752 = vmatprep.mubr.bf16.mxu0 %v1584_v55 }
 0x810   : > { %1753 = vmatmul.mubr.bf16.vlgmr.msra.gmra.mrb[16].mxu0 %v1583_v56 }
 0x811   : > { %4228 = vmatprep.mubr.msk.bf16.mxu0 %vm4671_vm1, %v4670_v11 }
 0x8e3   : > { %v4049_v57 = vpop.f32.mrb[16].mxu0 }
 0x8e4   : > { %v4050_v59 = vpop.f32.mrb[17].mxu0 }
 0x8e5   : > { %v4051_v60 = vadd.f32 %v4050_v59, %v4049_v57  ;;  %v4052_v61 = vpop.f32.mrb[18].mxu0 }
 0x8e6   : > { %v4053_v62 = vpop.f32.mrb[19].mxu0 }
 0x8e7   : > { %v1755_v63 = vadd.f32 %v4051_v60, %v3852_v58 }
 0x8e9   : > { %v1760_v0 = vadd.f32 %v1755_v63, %v4993_v4  ;;  %v4411_v4 = vld [vmem:[%s5454_s12 + $0x18] ss:$12 sps:$4 sm:$0xff]   ;;  %s4677_s12 = smov [#allocation2]  }
 0x8ea   : > { %1895 = vmatpush1.bf16.msra.mxu1 %v4411_v4  ;;  %s4548_s13 = sshll.u32 %s4677_s12, 4  ;;  %s4549_s13 = int_to_ptr.vmem [resolvable:$false] %s4548_s13 }
 0x8eb   : > { %v1763_v1 = vsel %vm1027_vm0, %v1760_v0, 0.0  ;;  %1896 = vmatprep.subr.bf16.mxu1 %v4416_v14  ;;  %s4550_s14 = scalar_lea.vmem %s4549_s13, 256  ;;  %p4551_p0 = scmp.lt.s32.totalorder %s3665_s5, %s4549_s13 }
 0x8ec   : > { %1764 = vadd.xlane.f32.xlu1 %v1763_v1  ;;  %p4552_p1 = scmp.lt.s32.totalorder %s4550_s14, %s4544_s9 }
 0x8ee   : > { %1897 = vmatpush1.bf16.msra.mxu1 %v4414_v15  ;;  %p4553_p2 = por %p4552_p1, %p4551_p0 }
 0x8ef   : > { %1898 = vmatprep.subr.bf16.mxu1 %v4419_v16 }
 0x8f0   : > { %p4554_p3 = pnand %p4553_p2, %p4547_p13 }
 0x8f2   : > { %1899 = vmatpush1.bf16.msra.mxu1 %v4417_v19 }
 0x8f3   : > { %4214 = vmatprep.subr.bf16.mxu1 %v4670_v11 }
 0x979   : > { %v1765_v3 = vpop.xlane.xlu1 %1764 }
 0x97a   : > { %v1766_v5 = vmul.f32 0.015625, %v1765_v3 }
 0x97c   : > { %v1767_v6 = vsub.f32 %v1760_v0, %v1766_v5 }
 0x97e   : > { %v1768_v7 = vmul.f32 %v1767_v6, %v1767_v6 }
 0x980   : > { %v1769_v8 = vsel %vm1027_vm0, %v1768_v7, 0.0 }
 0x981   : > { %1770 = vadd.xlane.f32.xlu1 %v1769_v8 }
 0xa0e   : > { %v1771_v21 = vpop.xlane.xlu1 %1770 }
 0xa0f   : > { %v1772_v22 = vmul.f32 0.015625, %v1771_v21 }
 0xa11   : > { %v1773_v23 = vadd.f32 1e-12, %v1772_v22 }
 0xa13   : > { %4510 = vrsqrt.f32 %v1773_v23 }
 0xa1d   : > { %v4511_v24 = vpop.eup %4510 }
 0xa1e   : > { %v1775_v26 = vmul.f32 %v4511_v24, %v1767_v6 }
 0xa20   : > { %v1782_v28 = vmul.f32 %v3869_v25, %v1775_v26 }
 0xa22   : > { %v5040_v29 = vadd.f32 %v3870_v27, %v1782_v28 }
 0xa24   : > { %v1791_v31 = vpack.c.bf16 %v5040_v29, %v5040_v29  ;;  %1790 = vst.msk [vmem:[%s5047_s23] sm:$0xff] %vm1027_vm0, %v5040_v29 }
 0xa26   : > { %3883 = vmatmul.mubr.msk.bf16.vlgmr.msra.gmra.mrb[16].mxu1 %vm1027_vm0, %v1791_v31 }
 0xa27   : > { %4215 = vmatpush3.bf16.msra.mxu1 %v4420_v30  ;;  %4222 = vmatprep.mubr.msk.bf16.mxu1 %vm4671_vm1, %v4670_v11 }
 0xa28   : > { %4216 = vmatprep.subr.bf16.mxu1 %v4670_v11 }
 0xa2b   : > { %4217 = vmatpush3.bf16.msra.mxu1 %v4421_v33 }
 0xa2c   : > { %4218 = vmatprep.subr.bf16.mxu1 %v4670_v11 }
 0xa2f   : > { %4219 = vmatpush3.bf16.msra.mxu1 %v4422_v34 }
 0xa30   : > { %4220 = vmatprep.subr.bf16.mxu1 %v4670_v11 }
 0xa33   : > { %4221 = vmatpush3.bf16.msra.mxu1 %v4423_v35 }
 0xa34   : > { %4232 = vmatprep.subr.bf16.mxu1 %v4670_v11 }
 0xa36   : > { %4223 = vmatmul.mubr.msk.bf16.vlgmr.msra.gmra.mrb[20].mxu1 %vm1027_vm0, %v1791_v31 }
 0xa37   : > { %4234 = vmatprep.mubr.msk.bf16.mxu1 %vm4671_vm1, %v4670_v11 }
 0xaf9   : > { %v1926_v38 = vpop.f32.mrb[16].mxu1 }
 0xafa   : > { %v1928_v39 = vpop.f32.mrb[17].mxu1  ;;  %v1927_v45 = vadd.f32 %v1926_v38, %v1813_v40  ;;  %v4425_v38 = vld [vmem:[%s5465_s3 + $0x8] sm:$0xff]   ;;  %v4427_v40 = vld [vmem:[%s5465_s3 + $0x18] sm:$0xff]  }
 0xafb   : > { %v1929_v41 = vadd.f32 %v1928_v39, %v1817_v37  ;;  %v1930_v42 = vpop.f32.mrb[18].mxu1  ;;  %v4424_v37 = vld [vmem:[%s5465_s3] sm:$0xff]   ;;  %v4426_v39 = vld [vmem:[%s5465_s3 + $0x10] sm:$0xff]   ;;  %s5468_s3 = sld [smem:[#allocation21_spill]] }
 0xafc   : > { %v1931_v43 = vpop.f32.mrb[19].mxu1  ;;  %v1977_v47 = vpack.c.bf16 %v1927_v45, %v1927_v45 }
 0xafd   : > { %v1983_v44 = vpack.c.bf16 %v1929_v41, %v1929_v41  ;;  %1980 = vrot.lane.b32.xlu1 %v1929_v41, %s5464_s16 }
 0xaff   : > { %v1995_v46 = vsel %vm1130_vm2, %v1983_v44, 0 }
 0xb00   : > { %4227 = vmatpush3.bf16.xpose.msra.mxu0 %v1995_v46 }
 0xb01   : > { %1974 = vrot.lane.b32.xlu1 %v1927_v45, %s5464_s16  ;;  %4238 = vmatprep.subr.bf16.mxu0 %v4670_v11 }
 0xb07   : > { %4229 = vmatmul.mubr.msk.bf16.vlgmr.msra.gmra.mrb[20].mxu0 %vm1130_vm2, %v1977_v47 }
 0xb08   : > { %4240 = vmatprep.mubr.msk.bf16.mxu0 %vm4671_vm1, %v4670_v11 }
 0xb09   : > { %v1967_v49 = vpop.f32.mrb[20].mxu1 }
 0xb0a   : > { %v1968_v51 = vadd.f32 %v1967_v49, %v1821_v48  ;;  %v4224_v52 = vpop.f32.mrb[21].mxu1 }
 0xb0b   : > { %v1970_v53 = vpop.f32.mrb[22].mxu1 }
 0xb0c   : > { %v1989_v54 = vpack.c.bf16 %v1968_v51, %v1968_v51  ;;  %v4225_v9 = vpop.f32.mrb[23].mxu1 }
 0xb0e   : > { %v2111_v55 = vsel %vm1251_vm3, %v1989_v54, 0 }
 0xb0f   : > { %4239 = vmatpush3.bf16.msra.mxu0 %v2111_v55 }
 0xb10   : > { %4250 = vmatprep.subr.bf16.mxu0 %v4670_v11 }
 0xb6f   : > { %v1981_v56 = vpop.permute.xlu1 %1980 }
 0xb70   : > { %v1984_v57 = vpack.c.bf16 %v1981_v56, %v1981_v56 }
 0xb72   : > { %v2041_v58 = vsel %vm1130_vm2, %v1984_v57, 0 }
 0xb73   : > { %4233 = vmatpush3.bf16.xpose.msra.mxu1 %v2041_v58  ;;  %v1975_v59 = vpop.permute.xlu1 %1974 }
 0xb74   : > { %4244 = vmatprep.subr.bf16.mxu1 %v4670_v11  ;;  %v1978_v60 = vpack.c.bf16 %v1975_v59, %v1975_v59 }
 0xb7a   : > { %4235 = vmatmul.mubr.msk.bf16.vlgmr.msra.gmra.mrb[24].mxu1 %vm1130_vm2, %v1978_v60 }
 0xb7b   : > { %4246 = vmatprep.mubr.msk.bf16.mxu1 %vm4671_vm1, %v4670_v11 }
 0xbda   : > { %v2031_v61 = vpop.f32.mrb[20].mxu0 }
 0xbdb   : > { %v2032_v62 = vadd.f32 %v2031_v61, %v4954_v50  ;;  %v4230_v63 = vpop.f32.mrb[21].mxu0 }
 0xbdc   : > { %v2034_v0 = vpop.f32.mrb[22].mxu0 }
 0xbdd   : > { %v4231_v1 = vpop.f32.mrb[23].mxu0  ;;  %v2083_v3 = vsel %vm1223_vm4, %v2032_v62, -inf }
 0xbde   : > { %2084 = vmax.xlane.f32.xlu1 %v2083_v3  ;;  %v2318_v1 = vld [vmem:[%s5468_s3] sm:$0xff] }
 0xbdf   : > { %v2322_v3 = vld [vmem:[%s5468_s3 + $0x20] sm:$0xff] }
 0xc4d   : > { %v2077_v5 = vpop.f32.mrb[24].mxu1 }
 0xc4e   : > { %v2078_v6 = vadd.f32 %v2077_v5, %v4954_v50  ;;  %v4236_v7 = vpop.f32.mrb[25].mxu1  ;;  %v3898_v5 = vcombine.high %v2318_v1, %v2322_v3 }
 0xc4f   : > { %v2080_v8 = vpop.f32.mrb[26].mxu1  ;;  %v3897_v7 = vcombine.low %v2318_v1, %v2322_v3  ;;  %v2340_v1 = vld [vmem:[%s5468_s3 + $0xb0] sm:$0xff]  ;;  %v2341_v3 = vld [vmem:[%s5468_s3 + $0xb8] sm:$0xff] }
 0xc50   : > { %v4237_v10 = vpop.f32.mrb[27].mxu1  ;;  %v2086_v12 = vsel %vm1223_vm4, %v2078_v6, -inf }
 0xc51   : > { %2087 = vmax.xlane.f32.xlu0 %v2086_v12  ;;  %v2326_v12 = vld [vmem:[%s5468_s3 + $0x40] sm:$0xff] }
 0xc6b   : > { %v2085_v19 = vpop.xlane.xlu1 %2084 }
 0xc6c   : > { %v2089_v21 = vsub.f32 %v2032_v62, %v2085_v19 }
 0xc6e   : > { %v2091_v22 = vmul.f32 1.442695, %v2089_v21 }
 0xcde   : > { %v2088_v13 = vpop.xlane.xlu0 %2087 }
 0xcdf   : > { %v2090_v4 = vsub.f32 %v2078_v6, %v2088_v13  ;;  %v2323_v6 = vld [vmem:[%s5468_s3 + $0x28] sm:$0xff]  ;;  %v2330_v13 = vld [vmem:[%s5468_s3 + $0x60] sm:$0xff] }
 0xce1   : > { %v2093_v14 = vmul.f32 1.442695, %v2090_v4  ;;  %v2327_v4 = vld [vmem:[%s5468_s3 + $0x48] sm:$0xff] }
 0xce3   : > { %4512 = vpow2.f32 %v2093_v14  ;;  %v3906_v14 = vcombine.high %v2326_v12, %v2330_v13 }
 0xce4   : > { %4514 = vpow2.f32 %v2091_v22  ;;  %v2334_v22 = vld [vmem:[%s5468_s3 + $0x80] sm:$0xff] }
 0xced   : > { %v4513_v15 = vpop.eup %4512 }
 0xcee   : > { %v2098_v16 = vsel %vm1223_vm4, %v4513_v15, 0.0  ;;  %v4515_v50 = vpop.eup %4514 }
 0xcef   : > { %2099 = vadd.xlane.f32.xlu0 %v2098_v16  ;;  %v2095_v23 = vsel %vm1223_vm4, %v4515_v50, 0.0  ;;  %v3905_v16 = vcombine.low %v2326_v12, %v2330_v13  ;;  %v2345_v12 = vld [vmem:[%s5468_s3 + $0xd8] sm:$0xff] }
 0xcf0   : > { %v2349_v13 = vld [vmem:[%s5468_s3 + $0xf8] sm:$0xff] }
 0xd05   : > { %1986 = vrot.lane.b32.xlu0 %v1968_v51, %s5464_s16  ;;  %s5466_s16 = sld [smem:[#allocation18_spill]] }
 0xd0b   : > { %v3889_v53 = vld [vmem:[%s5466_s16] ss:$0 sm:$0xff]  ;;  %s5470_s16 = sld [smem:[#allocation20_spill]] }
 0xd24   : > { %2096 = vadd.xlane.f32.xlu0 %v2095_v23  ;;  %v2335_v23 = vld [vmem:[%s5468_s3 + $0x88] sm:$0xff] }
 0xd7c   : > { %v2100_v24 = vpop.xlane.xlu0 %2099 }
 0xd7d   : > { %4516 = vrcp.f32 %v2100_v24 }
 0xd80   : > { %v1987_v25 = vpop.permute.xlu0 %1986 }
 0xd81   : > { %v1990_v26 = vpack.c.bf16 %v1987_v25, %v1987_v25  ;;  %v2339_v25 = vld [vmem:[%s5468_s3 + $0xa8] sm:$0xff] }
 0xd83   : > { %v2157_v27 = vsel %vm1251_vm3, %v1990_v26, 0 }
 0xd84   : > { %4245 = vmatpush3.bf16.msra.mxu1 %v2157_v27  ;;  %v3915_v27 = vcombine.low %v2335_v23, %v2339_v25 }
 0xd85   : > { %2555 = vmatprep.subr.bf16.mxu1 %v3898_v5 }
 0xd87   : > { %v4517_v28 = vpop.eup %4516 }
 0xd88   : > { %v2104_v30 = vmul.f32 %v4517_v28, %v4513_v15  ;;  %v2331_v15 = vld [vmem:[%s5468_s3 + $0x68] sm:$0xff]  ;;  %v3916_v28 = vcombine.high %v2335_v23, %v2339_v25 }
 0xd89   : > { %v3907_v19 = vcombine.low %v2327_v4, %v2331_v15  ;;  %v3908_v21 = vcombine.high %v2327_v4, %v2331_v15 }
 0xd8a   : > { %v2106_v31 = vpack.c.bf16 %v2104_v30, %v2104_v30  ;;  %v2342_v30 = vld [vmem:[%s5468_s3 + $0xc0] sm:$0xff] }
 0xd8c   : > { %4247 = vmatmul.mubr.msk.bf16.vlgmr.msra.gmra.mrb[28].mxu1 %vm1223_vm4, %v2106_v31  ;;  %v2346_v31 = vld [vmem:[%s5468_s3 + $0xe0] sm:$0xff] }
 0xd8d   : > { %2587 = vmatprep.mubr.bf16.mxu1 %v4669_v2  ;;  %2556 = vmatpush1.bf16.msra.mxu1 %v3897_v7 }
 0xd8e   : > { %2557 = vmatprep.subr.bf16.mxu1 %v3906_v14 }
 0xd91   : > { %2558 = vmatpush1.bf16.msra.mxu1 %v3905_v16  ;;  %v3928_v16 = vcombine.high %v2345_v12, %v2349_v13 }
 0xdb1   : > { %v2097_v33 = vpop.xlane.xlu0 %2096 }
 0xdb2   : > { %4518 = vrcp.f32 %v2097_v33  ;;  %v2343_v33 = vld [vmem:[%s5468_s3 + $0xc8] sm:$0xff] }
 0xdbc   : > { %v4519_v34 = vpop.eup %4518 }
 0xdbd   : > { %v2103_v35 = vmul.f32 %v4519_v34, %v4515_v50  ;;  %v2338_v50 = vld [vmem:[%s5468_s3 + $0xa0] sm:$0xff]  ;;  %v3921_v34 = vcombine.low %v2342_v30, %v2346_v31 }
 0xdbe   : > { %v3914_v24 = vcombine.high %v2334_v22, %v2338_v50  ;;  %v3913_v26 = vcombine.low %v2334_v22, %v2338_v50 }
 0xdbf   : > { %v2105_v36 = vpack.c.bf16 %v2103_v35, %v2103_v35  ;;  %v3922_v35 = vcombine.high %v2342_v30, %v2346_v31 }
 0xdc0   : > { %2559 = vmatprep.subr.bf16.mxu1 %v3914_v24 }
 0xdc1   : > { %4241 = vmatmul.mubr.msk.bf16.vlgmr.msra.gmra.mrb[24].mxu0 %vm1223_vm4, %v2105_v36  ;;  %2560 = vmatpush1.bf16.msra.mxu1 %v3913_v26  ;;  %v2347_v36 = vld [vmem:[%s5468_s3 + $0xe8] sm:$0xff] }
 0xdc2   : > { %4258 = vmatprep.mubr.msk.bf16.mxu0 %vm4671_vm1, %v4670_v11  ;;  %4251 = vmatpush3.bf16.msra.mxu0 %v4424_v37  ;;  %v2320_v37 = vld [vmem:[%s5468_s3 + $0x10] sm:$0xff] }
 0xdc3   : > { %4252 = vmatprep.subr.bf16.mxu0 %v4670_v11  ;;  %2561 = vmatprep.subr.bf16.mxu1 %v3922_v35 }
 0xdc5   : > { %2562 = vmatpush1.bf16.msra.mxu1 %v3921_v34 }
 0xdc6   : > { %4253 = vmatpush3.bf16.msra.mxu0 %v4425_v38  ;;  %v2324_v38 = vld [vmem:[%s5468_s3 + $0x30] sm:$0xff] }
 0xdc7   : > { %4254 = vmatprep.subr.bf16.mxu0 %v4670_v11 }
 0xdca   : > { %4255 = vmatpush3.bf16.msra.mxu0 %v4426_v39  ;;  %v3923_v39 = vcombine.low %v2343_v33, %v2347_v36 }
 0xdcb   : > { %4256 = vmatprep.subr.bf16.mxu0 %v4670_v11 }
 0xdce   : > { %4257 = vmatpush3.bf16.msra.mxu0 %v4427_v40  ;;  %v3924_v40 = vcombine.high %v2343_v33, %v2347_v36 }
 0xe5f   : > { %v2193_v41 = vpop.f32.mrb[28].mxu1 }
 0xe60   : > { %v4248_v42 = vpop.f32.mrb[29].mxu1  ;;  %2200 = vrot.lane.b32.xlu1 %v2193_v41, %s5467_s2  ;;  %v3901_v41 = vcombine.low %v2320_v37, %v2324_v38  ;;  %s5469_s2 = sld [smem:[#allocation19_spill]] }
 0xe61   : > { %v2196_v43 = vpop.f32.mrb[30].mxu1  ;;  %v3902_v42 = vcombine.high %v2320_v37, %v2324_v38 }
 0xe62   : > { %v4249_v44 = vpop.f32.mrb[31].mxu1  ;;  %v2321_v43 = vld [vmem:[%s5468_s3 + $0x18] sm:$0xff] }
 0xe63   : > { %v2325_v44 = vld [vmem:[%s5468_s3 + $0x38] sm:$0xff]  ;;  %2637 = vmatprep.subr.bf16.mxu1 %v3902_v42 }
 0xe94   : > { %v2147_v45 = vpop.f32.mrb[24].mxu0 }
 0xe95   : > { %v4242_v46 = vpop.f32.mrb[25].mxu0 }
 0xe96   : > { %v2150_v47 = vpop.f32.mrb[26].mxu0  ;;  %v3904_v46 = vcombine.high %v2321_v43, %v2325_v44 }
 0xe97   : > { %v4243_v48 = vpop.f32.mrb[27].mxu0 }
 0xed2   : > { %v2201_v49 = vpop.permute.xlu1 %2200 }
 0xed3   : > { %v2203_v51 = vsel %vm1130_vm2, %v2147_v45, %v2201_v49  ;;  %v3903_v45 = vcombine.low %v2321_v43, %v2325_v44 }
 0xed4   : > { %v2204_v52 = vpack.c.bf16 %v2203_v51, %v2203_v51 }
 0xed6   : > { %4259 = vmatmul.mubr.msk.bf16.vlgmr.msra.gmra.mrb[28].mxu0 %vm1027_vm0, %v2204_v52  ;;  %v3895_v52 = vld [vmem:[%s5469_s2] ss:$0 sm:$0xff]  ;;  %s5471_s2 = sld [smem:[#allocation25_spill]] }
 0xed7   : > { %2628 = vmatprep.mubr.bf16.mxu0 %v4669_v2 }
 0xedc   : > { %v4429_v22 = vld [vmem:[%s5471_s2 + $0x8] sm:$0xff]   ;;  %v4430_v50 = vld [vmem:[%s5471_s2 + $0x10] sm:$0xff]   ;;  %v4431_v23 = vld [vmem:[%s5471_s2 + $0x18] sm:$0xff]  }
 0xfa9   : > { %v2281_v54 = vpop.f32.mrb[28].mxu0 }
 0xfaa   : > { %v2282_v9 = vadd.f32 %v3889_v53, %v2281_v54  ;;  %v4260_v55 = vpop.f32.mrb[29].mxu0  ;;  %v3896_v54 = vld [vmem:[%s5470_s16] ss:$0 sm:$0xff]  ;;  %s5472_s16 = sld [smem:[#allocation26_spill]] }
 0xfab   : > { %v2284_v56 = vpop.f32.mrb[30].mxu0  ;;  %v2328_v55 = vld [vmem:[%s5468_s3 + $0x50] sm:$0xff] }
 0xfac   : > { %v4261_v57 = vpop.f32.mrb[31].mxu0  ;;  %v2287_v58 = vadd.f32 %v2282_v9, %v5040_v29  ;;  %v2319_v29 = vld [vmem:[%s5468_s3 + $0x8] sm:$0xff]  ;;  %v2332_v56 = vld [vmem:[%s5468_s3 + $0x70] sm:$0xff] }
 0xfad   : > { %v3899_v8 = vcombine.low %v2319_v29, %v2323_v6  ;;  %v3900_v10 = vcombine.high %v2319_v29, %v2323_v6  ;;  %v2329_v57 = vld [vmem:[%s5468_s3 + $0x58] sm:$0xff]  ;;  %v3909_v29 = vcombine.low %v2328_v55, %v2332_v56 }
 0xfae   : > { %v2290_v59 = vsel %vm1027_vm0, %v2287_v58, 0.0 }
 0xfaf   : > { %2291 = vadd.xlane.f32.xlu1 %v2290_v59  ;;  %2596 = vmatprep.subr.bf16.mxu0 %v3900_v10  ;;  %v2348_v10 = vld [vmem:[%s5468_s3 + $0xf0] sm:$0xff] }
 0xfb0   : > { %2597 = vmatpush1.bf16.msra.mxu0 %v3899_v8  ;;  %v2344_v8 = vld [vmem:[%s5468_s3 + $0xd0] sm:$0xff] }
 0xfb1   : > { %2598 = vmatprep.subr.bf16.mxu0 %v3908_v21  ;;  %v3926_v15 = vcombine.high %v2344_v8, %v2348_v10  ;;  %v3927_v21 = vcombine.low %v2345_v12, %v2349_v13 }
 0xfb4   : > { %2599 = vmatpush1.bf16.msra.mxu0 %v3907_v19  ;;  %v3925_v19 = vcombine.low %v2344_v8, %v2348_v10 }
 0xfb5   : > { %2600 = vmatprep.subr.bf16.mxu0 %v3916_v28 }
 0xfb8   : > { %2601 = vmatpush1.bf16.msra.mxu0 %v3915_v27 }
 0xfb9   : > { %2602 = vmatprep.subr.bf16.mxu0 %v3924_v40 }
 0xfbc   : > { %2603 = vmatpush1.bf16.msra.mxu0 %v3923_v39 }
 0xfbd   : > { %2678 = vmatprep.subr.bf16.mxu0 %v3904_v46 }
0x103c   : > { %v2292_v60 = vpop.xlane.xlu1 %2291 }
0x103d   : > { %v2293_v61 = vmul.f32 0.015625, %v2292_v60 }
0x103f   : > { %v5110_v62 = vsub.f32 %v2287_v58, %v2293_v61  ;;  %v2333_v58 = vld [vmem:[%s5468_s3 + $0x78] sm:$0xff]  ;;  %v3910_v61 = vcombine.high %v2328_v55, %v2332_v56 }
0x1040   : > { %v3911_v5 = vcombine.low %v2329_v57, %v2333_v58 }
0x1041   : > { %v2295_v63 = vmul.f32 %v5110_v62, %v5110_v62 }
0x1043   : > { %v2296_v0 = vsel %vm1027_vm0, %v2295_v63, 0.0  ;;  %v3912_v63 = vcombine.high %v2329_v57, %v2333_v58 }
0x1044   : > { %2297 = vadd.xlane.f32.xlu0 %v2296_v0  ;;  %v2336_v0 = vld [vmem:[%s5468_s3 + $0x90] sm:$0xff] }
0x1045   : > { %v3918_v6 = vcombine.high %v2336_v0, %v2340_v1  ;;  %v3917_v4 = vcombine.low %v2336_v0, %v2340_v1 }
0x10d1   : > { %v2298_v47 = vpop.xlane.xlu0 %2297 }
0x10d2   : > { %v2299_v48 = vmul.f32 0.015625, %v2298_v47 }
0x10d4   : > { %v2300_v49 = vadd.f32 1e-12, %v2299_v48 }
0x10d6   : > { %4520 = vrsqrt.f32 %v2300_v49 }
0x10e0   : > { %v4521_v51 = vpop.eup %4520 }
0x10e1   : > { %v2302_v53 = vmul.f32 %v4521_v51, %v5110_v62  ;;  %v2337_v62 = vld [vmem:[%s5468_s3 + $0x98] sm:$0xff] }
0x10e2   : > { %v3920_v7 = vcombine.high %v2337_v62, %v2341_v3  ;;  %v3919_v14 = vcombine.low %v2337_v62, %v2341_v3 }
0x10e3   : > { %v2309_v9 = vmul.f32 %v3895_v52, %v2302_v53 }
0x10e5   : > { %v5142_v59 = vadd.f32 %v3896_v54, %v2309_v9  ;;  %v4674_v54 = vmov 1  }
0x10e6   : > { %4356 = vset.pattern.permute.xlu1 %v4674_v54 }
0x10e7   : > { %v2317_v60 = vpack.c.bf16 %v5142_v59, %v5142_v59 }
0x10e9   : > { %3929 = vmatmul.mubr.msk.bf16.vlgmr.msra.gmra.mrb[32].mxu1 %vm1027_vm0, %v2317_v60  ;;  %3930 = vmatmul.mubr.msk.bf16.vlgmr.msra.gmra.mrb[32].mxu0 %vm1027_vm0, %v2317_v60 }
0x10ea   : > { %2638 = vmatpush1.bf16.msra.mxu1 %v3901_v41  ;;  %2679 = vmatpush1.bf16.msra.mxu0 %v3903_v45  ;;  %v3933_v41 = vld [vmem:[%s5472_s16] ss:$0 sm:$0xff]  ;;  %s5474_s16 = sld [smem:[#allocation22_spill]] }
0x10eb   : > { %2639 = vmatprep.subr.bf16.mxu1 %v3910_v61  ;;  %2680 = vmatprep.subr.bf16.mxu0 %v3912_v63 }
0x10ec   : > { %2669 = vmatprep.mubr.bf16.mxu1 %v4669_v2  ;;  %2710 = vmatprep.mubr.bf16.mxu0 %v4669_v2  ;;  %v4428_v2 = vld [vmem:[%s5471_s2] sm:$0xff]   ;;  %s5473_s2 = sld [smem:[#allocation23_spill]] }
0x10ee   : > { %2640 = vmatpush1.bf16.msra.mxu1 %v3909_v29  ;;  %2681 = vmatpush1.bf16.msra.mxu0 %v3911_v5 }
0x10ef   : > { %2641 = vmatprep.subr.bf16.mxu1 %v3918_v6  ;;  %2682 = vmatprep.subr.bf16.mxu0 %v3920_v7 }
0x10f2   : > { %2642 = vmatpush1.bf16.msra.mxu1 %v3917_v4  ;;  %2683 = vmatpush1.bf16.msra.mxu0 %v3919_v14  ;;  %v4432_v9 = vld [vmem:[%s5473_s2 + $0x40] sm:$0xff]   ;;  %v4436_v58 = vld [vmem:[%s5473_s2 + $0x48] sm:$0xff]   ;;  %v4440_v0 = vld [vmem:[%s5473_s2 + $0x50] sm:$0xff]  }
0x10f3   : > { %2643 = vmatprep.subr.bf16.mxu1 %v3926_v15  ;;  %2684 = vmatprep.subr.bf16.mxu0 %v3928_v16  ;;  %v4433_v55 = vld [vmem:[%s5473_s2 + $0xc0] sm:$0xff]   ;;  %v4438_v61 = vld [vmem:[%s5473_s2 + $0x8] sm:$0xff]   ;;  %v4441_v1 = vld [vmem:[%s5473_s2 + $0xd0] sm:$0xff]  }
0x10f4   : > { %v4434_v56 = vld [vmem:[%s5473_s2] sm:$0xff]   ;;  %v4439_v63 = vld [vmem:[%s5473_s2 + $0x88] sm:$0xff]   ;;  %v4442_v62 = vld [vmem:[%s5473_s2 + $0x10] sm:$0xff]  }
0x10f5   : > { %v4435_v57 = vld [vmem:[%s5473_s2 + $0x80] sm:$0xff]   ;;  %v4443_v3 = vld [vmem:[%s5473_s2 + $0x90] sm:$0xff]   ;;  %v4444_v29 = vld [vmem:[%s5473_s2 + $0x58] sm:$0xff]  }
0x10f6   : > { %2644 = vmatpush1.bf16.msra.mxu1 %v3925_v19  ;;  %2685 = vmatpush1.bf16.msra.mxu0 %v3927_v21  ;;  %v4445_v5 = vld [vmem:[%s5473_s2 + $0xd8] sm:$0xff]   ;;  %v4448_v8 = vld [vmem:[%s5473_s2 + $0x60] sm:$0xff]   ;;  %v4452_v4 = vld [vmem:[%s5473_s2 + $0x68] sm:$0xff]  }
0x10f7   : > { %4262 = vmatprep.subr.bf16.mxu1 %v4670_v11  ;;  %4078 = vmatprep.subr.bf16.mxu0 %v4432_v9  ;;  %v4446_v6 = vld [vmem:[%s5473_s2 + $0x18] sm:$0xff]   ;;  %v4449_v10 = vld [vmem:[%s5473_s2 + $0xe0] sm:$0xff]   ;;  %v4453_v14 = vld [vmem:[%s5473_s2 + $0xe8] sm:$0xff]  }
0x10f8   : > { %v4447_v7 = vld [vmem:[%s5473_s2 + $0x98] sm:$0xff]   ;;  %v4450_v12 = vld [vmem:[%s5473_s2 + $0x20] sm:$0xff]   ;;  %v4454_v15 = vld [vmem:[%s5473_s2 + $0x28] sm:$0xff]  }
0x10f9   : > { %3931 = vmatmul.mubr.msk.bf16.vlgmr.msra.gmra.mrb[36].mxu1 %vm1027_vm0, %v2317_v60  ;;  %3932 = vmatmul.mubr.msk.bf16.vlgmr.msra.gmra.mrb[36].mxu0 %vm1027_vm0, %v2317_v60  ;;  %v4451_v13 = vld [vmem:[%s5473_s2 + $0xa0] sm:$0xff]   ;;  %v4455_v16 = vld [vmem:[%s5473_s2 + $0xa8] sm:$0xff]   ;;  %v4456_v19 = vld [vmem:[%s5473_s2 + $0x70] sm:$0xff]  }
0x10fa   : > { %4263 = vmatpush3.bf16.msra.mxu1 %v4428_v2  ;;  %4270 = vmatprep.mubr.msk.bf16.mxu1 %vm4671_vm1, %v4670_v11  ;;  %v4457_v21 = vld [vmem:[%s5473_s2 + $0xf0] sm:$0xff]  }
0x10fb   : > { %4264 = vmatprep.subr.bf16.mxu1 %v4670_v11  ;;  %4079 = vmatpush3.bf16.msra.mxu0 %v4434_v56  ;;  %v4458_v2 = vld [vmem:[%s5473_s2 + $0x30] sm:$0xff]  }
0x10fc   : > { %4080 = vmatprep.subr.bf16.mxu0 %v4436_v58 }
0x10fe   : > { %4265 = vmatpush3.bf16.msra.mxu1 %v4429_v22  ;;  %v4459_v22 = vld [vmem:[%s5473_s2 + $0xb0] sm:$0xff]  }
0x10ff   : > { %4266 = vmatprep.subr.bf16.mxu1 %v4670_v11  ;;  %4081 = vmatpush3.bf16.msra.mxu0 %v4438_v61 }
0x1100   : > { %4082 = vmatprep.subr.bf16.mxu0 %v4440_v0 }
0x1102   : > { %4267 = vmatpush3.bf16.msra.mxu1 %v4430_v50 }
0x1103   : > { %4268 = vmatprep.subr.bf16.mxu1 %v4670_v11  ;;  %4083 = vmatpush3.bf16.msra.mxu0 %v4442_v62 }
0x1104   : > { %4084 = vmatprep.subr.bf16.mxu0 %v4444_v29 }
0x1106   : > { %4269 = vmatpush3.bf16.msra.mxu1 %v4431_v23 }
0x1107   : > { %4100 = vmatprep.subr.bf16.mxu1 %v4433_v55  ;;  %4085 = vmatpush3.bf16.msra.mxu0 %v4446_v6 }
0x1108   : > { %4086 = vmatprep.subr.bf16.mxu0 %v4448_v8 }
0x1109   : > { %4271 = vmatmul.mubr.msk.bf16.vlgmr.msra.gmra.mrb[40].mxu1 %vm1027_vm0, %v2317_v60  ;;  %v4437_v60 = vld [vmem:[%s5473_s2 + $0xc8] sm:$0xff]  }
0x110a   : > { %4101 = vmatpush3.bf16.msra.mxu1 %v4435_v57 }
0x110b   : > { %4102 = vmatprep.subr.bf16.mxu1 %v4437_v60  ;;  %4087 = vmatpush3.bf16.msra.mxu0 %v4450_v12 }
0x110c   : > { %4088 = vmatprep.subr.bf16.mxu0 %v4452_v4 }
0x110e   : > { %4103 = vmatpush3.bf16.msra.mxu1 %v4439_v63 }
0x110f   : > { %4104 = vmatprep.subr.bf16.mxu1 %v4441_v1  ;;  %4089 = vmatpush3.bf16.msra.mxu0 %v4454_v15 }
0x1110   : > { %4090 = vmatprep.subr.bf16.mxu0 %v4456_v19 }
0x1112   : > { %4105 = vmatpush3.bf16.msra.mxu1 %v4443_v3 }
0x1113   : > { %4106 = vmatprep.subr.bf16.mxu1 %v4445_v5  ;;  %4091 = vmatpush3.bf16.msra.mxu0 %v4458_v2 }
0x1116   : > { %4107 = vmatpush3.bf16.msra.mxu1 %v4447_v7 }
0x1117   : > { %4108 = vmatprep.subr.bf16.mxu1 %v4449_v10 }
0x111a   : > { %4109 = vmatpush3.bf16.msra.mxu1 %v4451_v13 }
0x111b   : > { %4110 = vmatprep.subr.bf16.mxu1 %v4453_v14  ;;  %v2370_v14 = vsub.s32 4, %v4922_v17 }
0x111e   : > { %4111 = vmatpush3.bf16.msra.mxu1 %v4455_v16  ;;  %v2378_v16 = vsub.s32 6, %v4922_v17 }
0x111f   : > { %4112 = vmatprep.subr.bf16.mxu1 %v4457_v21 }
0x1122   : > { %4113 = vmatpush3.bf16.msra.mxu1 %v4459_v22 }
0x11bc   : > { %v5171_v24 = vpop.f32.mrb[32].mxu1  ;;  %v5173_v25 = vpop.f32.mrb[32].mxu0 }
0x11bd   : > { %v5175_v26 = vpop.f32.mrb[33].mxu1  ;;  %v5177_v27 = vpop.f32.mrb[33].mxu0 }
0x11be   : > { %v2593_v28 = vpop.f32.mrb[34].mxu1  ;;  %v2634_v30 = vpop.f32.mrb[34].mxu0 }
0x11bf   : > { %v2594_v31 = vpop.f32.mrb[35].mxu1  ;;  %v2635_v33 = vpop.f32.mrb[35].mxu0  ;;  %v4460_v30 = vld [vmem:[%s5473_s2 + $0x78] sm:$0xff]  }
0x11c0   : > { %v4461_v31 = vld [vmem:[%s5473_s2 + $0xf8] sm:$0xff]   ;;  %4092 = vmatprep.subr.bf16.mxu0 %v4460_v30 }
0x11c1   : > { %v4462_v33 = vld [vmem:[%s5473_s2 + $0x38] sm:$0xff]   ;;  %4114 = vmatprep.subr.bf16.mxu1 %v4461_v31 }
0x11c2   : > { %4093 = vmatpush3.bf16.msra.mxu0 %v4462_v33 }
0x11cc   : > { %v5179_v34 = vpop.f32.mrb[36].mxu1  ;;  %v5181_v35 = vpop.f32.mrb[36].mxu0 }
0x11cd   : > { %v5183_v11 = vpop.f32.mrb[37].mxu1  ;;  %v5185_v36 = vpop.f32.mrb[37].mxu0 }
0x11ce   : > { %v2675_v37 = vpop.f32.mrb[38].mxu1  ;;  %v2716_v38 = vpop.f32.mrb[38].mxu0 }
0x11cf   : > { %v2676_v39 = vpop.f32.mrb[39].mxu1  ;;  %v2717_v40 = vpop.f32.mrb[39].mxu0  ;;  %v4463_v37 = vld [vmem:[%s5473_s2 + $0xb8] sm:$0xff]   ;;  %v4464_v38 = vld [vmem:[%s5473_s2 + $0x140] sm:$0xff]  }
0x11d0   : > { %4115 = vmatpush3.bf16.msra.mxu1 %v4463_v37  ;;  %v4465_v39 = vld [vmem:[%s5473_s2 + $0x1c0] sm:$0xff]   ;;  %v4675_v40 = vmov 2   ;;  %4122 = vmatprep.subr.bf16.mxu0 %v4464_v38 }
0x11d1   : > { %4144 = vmatprep.subr.bf16.mxu1 %v4465_v39 }
0x11dc   : > { %v2864_v42 = vpop.f32.mrb[40].mxu1 }
0x11dd   : > { %v2865_v43 = vadd.f32 %v3933_v41, %v2864_v42  ;;  %v4272_v44 = vpop.f32.mrb[41].mxu1  ;;  %v4676_v41 = vmov 3   ;;  %v2350_v42 = vld [vmem:[%s5474_s16] sm:$0xff]  ;;  %s5475_s16 = sld [smem:[#allocation24_spill]] }
0x11de   : > { %v2867_v45 = vpop.f32.mrb[42].mxu1  ;;  %v2363_v44 = vrot.slane %v2350_v42, %v4941_v32  ;;  %v2371_v21 = vrot.slane %v2350_v42, %v2370_v14  ;;  %v2379_v22 = vrot.slane %v2350_v42, %v2378_v16  ;;  %v4471_v16 = vld [vmem:[%s5473_s2 + $0x188] sm:$0xff]  }
0x11df   : > { %v4273_v46 = vpop.f32.mrb[43].mxu1  ;;  %v2871_v47 = vsel %vm2870_vm5, %v2865_v43, -inf }
0x11e0   : > { %2872 = vmax.xlane.f32.xlu0 %v2871_v47  ;;  %v2355_v46 = vrot.slane %v2350_v42, %v4929_v20  ;;  %v2359_v47 = vrot.slane %v2350_v42, %v4925_v18  ;;  %v2382_v20 = vsub.s32 7, %v4922_v17 }
0x11e2   : > { %v2383_v55 = vrot.slane %v2350_v42, %v2382_v20 }
0x11e3   : > { %v3939_v20 = vld [vmem:[%s5475_s16] ss:$0 sm:$0xff] }
0x11e4   : > { %v5259_v61 = vadd.f32 %v5185_v36, %v2383_v55 }
0x11e6   : > { %v2734_v62 = vmul.f32 0.044715, %v5259_v61 }
0x11e8   : > { %v2742_v7 = vmul.f32 %v2734_v62, %v5259_v61 }
0x11ea   : > { %v2750_v15 = vmul.f32 %v2742_v7, %v5259_v61 }
0x11ec   : > { %v2758_v2 = vadd.f32 %v2750_v15, %v5259_v61  ;;  %v2726_v15 = vmul.f32 0.5, %v5259_v61 }
0x126d   : > { %v2873_v48 = vpop.xlane.xlu0 %2872 }
0x126e   : > { %v2874_v49 = vsub.f32 %v2865_v43, %v2873_v48  ;;  %v2366_v43 = vsub.s32 3, %v4922_v17  ;;  %v2374_v48 = vsub.s32 5, %v4922_v17 }
0x1270   : > { %v2875_v51 = vmul.f32 1.442695, %v2874_v49  ;;  %v2367_v45 = vrot.slane %v2350_v42, %v2366_v43  ;;  %v5233_v49 = vadd.f32 %v5173_v25, %v2363_v44  ;;  %v2375_v32 = vrot.slane %v2350_v42, %v2374_v48  ;;  %v3940_v48 = vld [vmem:[%s5475_s16 + $0x1] ss:$0 sm:$0xff] }
0x1272   : > { %4522 = vpow2.f32 %v2875_v51  ;;  %v5236_v51 = vadd.f32 %v5177_v27, %v2367_v45  ;;  %v2729_v54 = vmul.f32 0.044715, %v5233_v49  ;;  %v5250_v27 = vadd.f32 %v5183_v11, %v2375_v32 }
0x1273   : > { %v2721_v44 = vmul.f32 0.5, %v5233_v49 }
0x1274   : > { %v2730_v18 = vmul.f32 0.044715, %v5236_v51  ;;  %v2732_v58 = vmul.f32 0.044715, %v5250_v27  ;;  %v2722_v45 = vmul.f32 0.5, %v5236_v51 }
0x1276   : > { %v2740_v1 = vmul.f32 %v2732_v58, %v5250_v27 }
0x1278   : > { %v2748_v6 = vmul.f32 %v2740_v1, %v5250_v27  ;;  %v3941_v1 = vld [vmem:[%s5475_s16 + $0x2] ss:$0 sm:$0xff] }
0x127a   : > { %v2756_v4 = vadd.f32 %v2748_v6, %v5250_v27  ;;  %v4466_v6 = vld [vmem:[%s5473_s2 + $0x100] sm:$0xff]  }
0x127c   : > { %v5188_v52 = vpop.eup %4522  ;;  %v2764_v19 = vmul.f32 0.7978846, %v2756_v4 }
0x127d   : > { %v2877_v53 = vsel %vm2870_vm5, %v5188_v52, 0.0 }
0x127e   : > { %2878 = vadd.xlane.f32.xlu0 %v2877_v53  ;;  %v5242_v53 = vadd.f32 %v5175_v26, %v2359_v47  ;;  %v2738_v26 = vmul.f32 %v2730_v18, %v5236_v51 }
0x1280   : > { %v2728_v25 = vmul.f32 0.044715, %v5242_v53  ;;  %v2746_v63 = vmul.f32 %v2738_v26, %v5236_v51  ;;  %v2720_v47 = vmul.f32 0.5, %v5242_v53 }
0x1282   : > { %v2736_v57 = vmul.f32 %v2728_v25, %v5242_v53  ;;  %v2754_v29 = vadd.f32 %v2746_v63, %v5236_v51  ;;  %v2724_v63 = vmul.f32 0.5, %v5250_v27 }
0x1284   : > { %v2744_v0 = vmul.f32 %v2736_v57, %v5242_v53  ;;  %v2762_v10 = vmul.f32 0.7978846, %v2754_v29 }
0x1286   : > { %v2752_v36 = vadd.f32 %v2744_v0, %v5242_v53 }
0x1288   : > { %v2760_v13 = vmul.f32 0.7978846, %v2752_v36  ;;  %v4469_v36 = vld [vmem:[%s5473_s2 + $0x1c8] sm:$0xff]  }
0x130b   : > { %v2879_v50 = vpop.xlane.xlu0 %2878 }
0x130c   : > { %4524 = vrcp.f32 %v2879_v50  ;;  %v5278_v50 = vadd.f32 %v5179_v34, %v2371_v21  ;;  %v4470_v21 = vld [vmem:[%s5473_s2 + $0x108] sm:$0xff]  }
0x130e   : > { %v2731_v17 = vmul.f32 0.044715, %v5278_v50 }
0x1310   : > { %v2739_v34 = vmul.f32 %v2731_v17, %v5278_v50 }
0x1316   : > { %v4525_v23 = vpop.eup %4524 }
0x1317   : > { %v2881_v28 = vmul.f32 %v4525_v23, %v5188_v52  ;;  %v5239_v52 = vadd.f32 %v5171_v24, %v2355_v46  ;;  %v2737_v24 = vmul.f32 %v2729_v54, %v5233_v49  ;;  %v2766_v23 = vmul.f32 0.7978846, %v2758_v2 }
0x1319   : > { %2890 = vperm.xlu1 %4356, %v2881_v28   ;;  %2884 = vperm.xlu0 %4355, %v2881_v28   ;;  %v2727_v9 = vmul.f32 0.044715, %v5239_v52  ;;  %v2745_v60 = vmul.f32 %v2737_v24, %v5233_v49  ;;  %v2719_v46 = vmul.f32 0.5, %v5239_v52 }
0x131b   : > { %v2735_v56 = vmul.f32 %v2727_v9, %v5239_v52  ;;  %v2753_v3 = vadd.f32 %v2745_v60, %v5233_v49  ;;  %v2747_v9 = vmul.f32 %v2739_v34, %v5278_v50  ;;  %v4479_v34 = vld [vmem:[%s5473_s2 + $0x198] sm:$0xff]  }
0x131d   : > { %4357 = vset.pattern.permute.xlu1 %v4675_v40  ;;  %4359 = vset.pattern.permute.xlu0 %v4676_v41  ;;  %v2743_v11 = vmul.f32 %v2735_v56, %v5239_v52  ;;  %v2761_v8 = vmul.f32 0.7978846, %v2753_v3  ;;  %v4467_v3 = vld [vmem:[%s5473_s2 + $0x180] sm:$0xff]  }
0x131e   : > { %2896 = vperm.xlu1 %4357, %v2881_v28  }
0x131f   : > { %v2751_v5 = vadd.f32 %v2743_v11, %v5239_v52  ;;  %4526 = vtanh.f32 %v2761_v8  ;;  %v2755_v8 = vadd.f32 %v2747_v9, %v5278_v50  ;;  %v4488_v9 = vld [vmem:[%s5473_s2 + $0x170] sm:$0xff]  }
0x1320   : > { %4528 = vtanh.f32 %v2762_v10  ;;  %v4468_v10 = vld [vmem:[%s5473_s2 + $0x148] sm:$0xff]  }
0x1321   : > { %v2759_v12 = vmul.f32 0.7978846, %v2751_v5 }
0x1322   : > { %4358 = vset.pattern.permute.xlu1 %v4676_v41 }
0x1323   : > { %2902 = vperm.xlu1 %4358, %v2881_v28   ;;  %4530 = vtanh.f32 %v2759_v12  ;;  %v5281_v28 = vadd.f32 %v5181_v35, %v2379_v22  ;;  %v4473_v22 = vld [vmem:[%s5473_s2 + $0x1d0] sm:$0xff]  }
0x1324   : > { %4532 = vtanh.f32 %v2760_v13 }
0x1325   : > { %4534 = vtanh.f32 %v2764_v19  ;;  %v2733_v38 = vmul.f32 0.044715, %v5281_v28 }
0x1326   : > { %4536 = vtanh.f32 %v2766_v23 }
0x1327   : > { %v2741_v35 = vmul.f32 %v2733_v38, %v5281_v28  ;;  %v4474_v38 = vld [vmem:[%s5473_s2 + $0x110] sm:$0xff]  }
0x1329   : > { %v4527_v30 = vpop.eup %4526  ;;  %v2749_v49 = vmul.f32 %v2741_v35, %v5281_v28  ;;  %v4480_v35 = vld [vmem:[%s5473_s2 + $0x160] sm:$0xff]  }
0x132a   : > { %v4529_v31 = vpop.eup %4528  ;;  %v2777_v39 = vadd.f32 1.0, %v4527_v30 }
0x132b   : > { %v2778_v40 = vadd.f32 1.0, %v4529_v31  ;;  %v2757_v12 = vadd.f32 %v2749_v49, %v5281_v28  ;;  %v4472_v31 = vld [vmem:[%s5473_s2 + $0x150] sm:$0xff]  }
0x132c   : > { %v2785_v32 = vmul.f32 %v2777_v39, %v2721_v44  ;;  %v4477_v39 = vld [vmem:[%s5473_s2 + $0x1d8] sm:$0xff]   ;;  %v4483_v44 = vld [vmem:[%s5473_s2 + $0x1a0] sm:$0xff]   ;;  %v4490_v49 = vld [vmem:[%s5473_s2 + $0x130] sm:$0xff]  }
0x132d   : > { %v4531_v33 = vpop.eup %4530  ;;  %v2786_v54 = vmul.f32 %v2778_v40, %v2722_v45  ;;  %v2765_v23 = vmul.f32 0.7978846, %v2757_v12  ;;  %v4482_v45 = vld [vmem:[%s5473_s2 + $0x120] sm:$0xff]  }
0x132e   : > { %v4533_v37 = vpop.eup %4532  ;;  %v2775_v41 = vadd.f32 1.0, %v4531_v33  ;;  %v2763_v33 = vmul.f32 0.7978846, %v2755_v8 }
0x132f   : > { %v2776_v42 = vadd.f32 1.0, %v4533_v37  ;;  %v4535_v43 = vpop.eup %4534  ;;  %v4475_v37 = vld [vmem:[%s5473_s2 + $0x190] sm:$0xff]   ;;  %4538 = vtanh.f32 %v2765_v23 }
0x1330   : > { %v2783_v18 = vmul.f32 %v2775_v41, %v2719_v46  ;;  %v2780_v26 = vadd.f32 1.0, %v4535_v43  ;;  %v4537_v56 = vpop.eup %4536  ;;  %v4476_v41 = vld [vmem:[%s5473_s2 + $0x158] sm:$0xff]   ;;  %4540 = vtanh.f32 %v2763_v33  ;;  %v4481_v43 = vld [vmem:[%s5473_s2 + $0x1e0] sm:$0xff]   ;;  %v4485_v46 = vld [vmem:[%s5473_s2 + $0x1e8] sm:$0xff]  }
0x1331   : > { %v2784_v55 = vmul.f32 %v2776_v42, %v2720_v47  ;;  %v2782_v27 = vadd.f32 1.0, %v4537_v56  ;;  %v4478_v42 = vld [vmem:[%s5473_s2 + $0x118] sm:$0xff]   ;;  %v4484_v47 = vld [vmem:[%s5473_s2 + $0x168] sm:$0xff]  }
0x1332   : > { %v2788_v29 = vmul.f32 %v2780_v26, %v2724_v63  ;;  %v2725_v26 = vmul.f32 0.5, %v5281_v28  ;;  %v4494_v63 = vld [vmem:[%s5473_s2 + $0x138] sm:$0xff]  }
0x1333   : > { %v2790_v30 = vmul.f32 %v2782_v27, %v2726_v15 }
0x1398   : > { %v2891_v25 = vpop.permute.xlu1 %2890  ;;  %v2885_v24 = vpop.permute.xlu0 %2884 }
0x1399   : > { %v2893_v51 = vmul.f32 %v2891_v25, %v2785_v32  ;;  %v2894_v52 = vmul.f32 %v2891_v25, %v2786_v54  ;;  %v2887_v53 = vmul.f32 %v2885_v24, %v2783_v18  ;;  %v3054_v57 = vmul.f32 %v3940_v48, %v2891_v25  ;;  %v4539_v48 = vpop.eup %4538  ;;  %v4487_v32 = vld [vmem:[%s5473_s2 + $0x1a8] sm:$0xff]   ;;  %v4489_v18 = vld [vmem:[%s5473_s2 + $0x1f0] sm:$0xff]  }
0x139a   : > { %v2888_v58 = vmul.f32 %v2885_v24, %v2784_v55  ;;  %v3048_v60 = vmul.f32 %v3939_v20, %v2885_v24  ;;  %v4541_v54 = vpop.eup %4540  ;;  %v4486_v20 = vld [vmem:[%s5473_s2 + $0x128] sm:$0xff]   ;;  %v2781_v25 = vadd.f32 1.0, %v4539_v48  ;;  %v4491_v55 = vld [vmem:[%s5473_s2 + $0x1b0] sm:$0xff]  }
0x139b   : > { %v2909_v11 = vpack.c.bf16 %v2893_v51, %v2893_v51  ;;  %v2907_v0 = vpack.c.bf16 %v2887_v53, %v2887_v53  ;;  %v2910_v62 = vpack.c.bf16 %v2894_v52, %v2894_v52  ;;  %v2779_v24 = vadd.f32 1.0, %v4541_v54  ;;  %v4493_v51 = vld [vmem:[%s5473_s2 + $0x1f8] sm:$0xff]  }
0x139c   : > { %v2908_v5 = vpack.c.bf16 %v2888_v58, %v2888_v58  ;;  %v3055_v13 = vadd.f32 %v3054_v57, %v3048_v60  ;;  %v2723_v52 = vmul.f32 0.5, %v5278_v50  ;;  %v4492_v53 = vld [vmem:[%s5473_s2 + $0x178] sm:$0xff]   ;;  %v2789_v56 = vmul.f32 %v2781_v25, %v2725_v26  ;;  %v3942_v50 = vld [vmem:[%s5475_s16 + $0x3] ss:$0 sm:$0xff] }
0x139d   : > { %v5300_v7 = vpop.permute.xlu1 %2896  ;;  %3526 = vmatprep.mubr.bf16.mxu1 %v2910_v62  ;;  %v4495_v58 = vld [vmem:[%s5473_s2 + $0x1b8] sm:$0xff]   ;;  %s4011_s2 = sshll.u32 %s4855_s0, 7 }
0x139e   : > { %v2900_v4 = vmul.f32 %v5300_v7, %v2788_v29  ;;  %v3061_v14 = vmul.f32 %v3941_v1, %v5300_v7  ;;  %3486 = vmatprep.mubr.bf16.mxu0 %v2908_v5  ;;  %3527 = vmatmul.mubr.bf16.vlgmr.msra.gmra.mrb[44].mxu1 %v2909_v11  ;;  %v2787_v57 = vmul.f32 %v2779_v24, %v2723_v52  ;;  %s5353_s3 = scalar_lea.hbm %s4827_s27, %s4011_s2 }
0x139f   : > { %3487 = vmatmul.mubr.bf16.vlgmr.msra.gmra.mrb[40].mxu0 %v2907_v0  ;;  %4145 = vmatpush3.bf16.msra.mxu1 %v4467_v3 }
0x13a0   : > { %v5309_v19 = vadd.f32 %v3061_v14, %v3055_v13  ;;  %4123 = vmatpush3.bf16.msra.mxu0 %v4466_v6  ;;  %4146 = vmatprep.subr.bf16.mxu1 %v4469_v36  ;;  %v2912_v2 = vpack.c.bf16 %v2900_v4, %v2900_v4  ;;  %v2899_v28 = vmul.f32 %v5300_v7, %v2787_v57 }
0x13a1   : > { %4124 = vmatprep.subr.bf16.mxu0 %v4468_v10 }
0x13a2   : > { %v5314_v17 = vpop.permute.xlu1 %2902  ;;  %3566 = vmatprep.mubr.bf16.mxu0 %v2912_v2  ;;  %v2911_v0 = vpack.c.bf16 %v2899_v28, %v2899_v28 }
0x13a3   : > { %v2906_v61 = vmul.f32 %v5314_v17, %v2790_v30  ;;  %4147 = vmatpush3.bf16.msra.mxu1 %v4471_v16  ;;  %v2905_v60 = vmul.f32 %v5314_v17, %v2789_v56  ;;  %v3068_v1 = vmul.f32 %v3942_v50, %v5314_v17 }
0x13a4   : > { %4125 = vmatpush3.bf16.msra.mxu0 %v4470_v21  ;;  %4148 = vmatprep.subr.bf16.mxu1 %v4473_v22 }
0x13a5   : > { %4126 = vmatprep.subr.bf16.mxu0 %v4472_v31  ;;  %v2914_v40 = vpack.c.bf16 %v2906_v61, %v2906_v61  ;;  %v2913_v11 = vpack.c.bf16 %v2905_v60, %v2905_v60  ;;  %v3069_v8 = vadd.f32 %v3068_v1, %v5309_v19 }
0x13a7   : > { %4149 = vmatpush3.bf16.msra.mxu1 %v4475_v37  ;;  %3606 = vmatprep.mubr.bf16.mxu1 %v2914_v40 }
0x13a8   : > { %4127 = vmatpush3.bf16.msra.mxu0 %v4474_v38  ;;  %4150 = vmatprep.subr.bf16.mxu1 %v4477_v39 }
0x13a9   : > { %4128 = vmatprep.subr.bf16.mxu0 %v4476_v41 }
0x13ab   : > { %4151 = vmatpush3.bf16.msra.mxu1 %v4479_v34 }
0x13ac   : > { %4129 = vmatpush3.bf16.msra.mxu0 %v4478_v42  ;;  %4152 = vmatprep.subr.bf16.mxu1 %v4481_v43 }
0x13ad   : > { %4130 = vmatprep.subr.bf16.mxu0 %v4480_v35 }
0x13af   : > { %4153 = vmatpush3.bf16.msra.mxu1 %v4483_v44 }
0x13b0   : > { %4131 = vmatpush3.bf16.msra.mxu0 %v4482_v45  ;;  %4154 = vmatprep.subr.bf16.mxu1 %v4485_v46 }
0x13b1   : > { %4132 = vmatprep.subr.bf16.mxu0 %v4484_v47 }
0x13b3   : > { %4155 = vmatpush3.bf16.msra.mxu1 %v4487_v32 }
0x13b4   : > { %4133 = vmatpush3.bf16.msra.mxu0 %v4486_v20  ;;  %4156 = vmatprep.subr.bf16.mxu1 %v4489_v18 }
0x13b5   : > { %4134 = vmatprep.subr.bf16.mxu0 %v4488_v9 }
0x13b7   : > { %4157 = vmatpush3.bf16.msra.mxu1 %v4491_v55 }
0x13b8   : > { %4135 = vmatpush3.bf16.msra.mxu0 %v4490_v49  ;;  %4158 = vmatprep.subr.bf16.mxu1 %v4493_v51 }
0x13b9   : > { %4136 = vmatprep.subr.bf16.mxu0 %v4492_v53 }
0x13bb   : > { %4159 = vmatpush3.bf16.msra.mxu1 %v4495_v58 }
0x13bc   : > { %4137 = vmatpush3.bf16.msra.mxu0 %v4494_v63 }
0x13be   : > { %3607 = vmatmul.mubr.bf16.vlgmr.msra.gmra.mrb[48].mxu1 %v2913_v11 }
0x13bf   : > { %3567 = vmatmul.mubr.bf16.vlgmr.msra.gmra.mrb[44].mxu0 %v2911_v0 }
0x1471   : > { %v4116_v62 = vpop.f32.mrb[44].mxu1 }
0x1472   : > { %v4094_v3 = vpop.f32.mrb[40].mxu0  ;;  %v4117_v29 = vpop.f32.mrb[45].mxu1 }
0x1473   : > { %v4095_v5 = vpop.f32.mrb[41].mxu0  ;;  %v4118_v6 = vadd.f32 %v4117_v29, %v4116_v62  ;;  %v4119_v36 = vpop.f32.mrb[46].mxu1 }
0x1474   : > { %v4096_v10 = vadd.f32 %v4095_v5, %v4094_v3  ;;  %v4097_v7 = vpop.f32.mrb[42].mxu0  ;;  %v4120_v12 = vpop.f32.mrb[47].mxu1 }
0x1475   : > { %v4098_v27 = vpop.f32.mrb[43].mxu0 }
0x1476   : > { %v3489_v13 = vadd.f32 %v4096_v10, %v3069_v8 }
0x1478   : > { %v3529_v4 = vadd.f32 %v4118_v6, %v3489_v13 }
0x1491   : > { %v4160_v14 = vpop.f32.mrb[48].mxu1 }
0x1492   : > { %v4138_v15 = vpop.f32.mrb[44].mxu0  ;;  %v4161_v16 = vpop.f32.mrb[49].mxu1 }
0x1493   : > { %v4139_v21 = vpop.f32.mrb[45].mxu0  ;;  %v4162_v2 = vadd.f32 %v4161_v16, %v4160_v14  ;;  %v4163_v22 = vpop.f32.mrb[50].mxu1 }
0x1494   : > { %v4140_v23 = vadd.f32 %v4139_v21, %v4138_v15  ;;  %v4141_v30 = vpop.f32.mrb[46].mxu0  ;;  %v4164_v31 = vpop.f32.mrb[51].mxu1 }
0x1495   : > { %v4142_v19 = vpop.f32.mrb[47].mxu0 }
0x1496   : > { %v3569_v33 = vadd.f32 %v4140_v23, %v3529_v4 }
0x1498   : > { %v3609_v17 = vadd.f32 %v4162_v2, %v3569_v33 }
0x149a   : > { %v3614_v61 = vadd.f32 %v3609_v17, %v5142_v59 }
0x149c   : > { %v3617_v37 = vsel %vm1027_vm0, %v3614_v61, 0.0 }
0x149d   : > { %3618 = vadd.xlane.f32.xlu1 %v3617_v37 }
0x152a   : > { %v3619_v38 = vpop.xlane.xlu1 %3618 }
0x152b   : > { %v3620_v39 = vmul.f32 0.015625, %v3619_v38 }
0x152d   : > { %v3621_v40 = vsub.f32 %v3614_v61, %v3620_v39 }
0x152f   : > { %v3622_v41 = vmul.f32 %v3621_v40, %v3621_v40 }
0x1531   : > { %v3623_v34 = vsel %vm1027_vm0, %v3622_v41, 0.0 }
0x1532   : > { %3624 = vadd.xlane.f32.xlu0 %v3623_v34 }
0x1533   : > { %4557 = shalt.err (!%p4554_p3)
}
0x1534   : > { %s4558_s23 = scalar_lea.hbm %s5353_s3, 128  ;;  %s4562_s12 = scalar_lea.hbm %s4827_s27, 256 }
0x1535   : > { %p4559_p4 = scmp.ne.s32.totalorder %s5353_s3, %s4558_s23  ;;  %p4563_p9 = scmp.lt.u32.totalorder %s5353_s3, %s4827_s27 }
0x1536   : > { %p4564_p10 = scmp.lt.u32.totalorder %s4562_s12, %s4558_s23  ;;  %p4566_p12 = scmp.lt.u32.totalorder %s4558_s23, %s5353_s3 }
0x1537   : > { %p4560_p7 = pnand %p4559_p4, %p4872_p5 }
0x1538   : > { %p4565_p11 = por %p4564_p10, %p4563_p9 }
0x1539   : > { %p4561_p8 = pneg %p4560_p7 }
0x153a   : > { %p4567_p0 = por %p4566_p12, %p4565_p11 }
0x153c   : > { %p4568_p13 = pnand %p4567_p0, %p4561_p8 }
0x153e   : > { %4571 = shalt.err (!%p4568_p13)
}
0x153f   : > { %4274 = dma.vmem_to_hbm [thread:$0]  (%p4872_p5), %s3665_s5, 128, %s5353_s3, %s3646_s8   ;;  %v4007_v44 = vld [vmem:[%s4817_s6] ss:$0 sm:$0xff] }
0x1540   : > { %v4008_v46 = vld [vmem:[%s4822_s20] ss:$0 sm:$0xff]  ;;  %s5476_s9 = sshll.u32 %s5035_s22, 3  ;;  %s5377_s23 = scalar_lea.hbm %s4832_s4, %s4011_s2 }
0x1541   : > { %s917_s13 = scalar_lea.vmem [#allocation4], %s5476_s9  ;;  %s3651_s5 = scalar_lea.sflag [#allocation5], %s5035_s22 }
0x1542   : > { %s3677_s14 = sshll.u32 %s917_s13, 4  ;;  %s4678_s3 = smov [#allocation4]   ;;  %s5379_s14 = int_to_ptr.vmem [resolvable:$true] %s3677_s14 }
0x1543   : > { %s4572_s8 = scalar_lea.vmem %s5379_s14, 128  ;;  %s4576_s12 = sshll.u32 %s4678_s3, 4  ;;  %s4577_s12 = int_to_ptr.vmem [resolvable:$false] %s4576_s12 }
0x1544   : > { %p4573_p1 = scmp.ne.s32.totalorder %s5379_s14, %s4572_s8  ;;  %s4578_s9 = scalar_lea.vmem %s4577_s12, 256 }
0x1545   : > { %p4579_p4 = scmp.lt.s32.totalorder %s5379_s14, %s4577_s12  ;;  %p4580_p7 = scmp.lt.s32.totalorder %s4578_s9, %s4572_s8 }
0x1546   : > { %p4574_p2 = pnand %p4573_p1, %p4872_p5 }
0x1547   : > { %p4581_p8 = por %p4580_p7, %p4579_p4 }
0x1548   : > { %p4575_p3 = pneg %p4574_p2 }
0x154a   : > { %p4582_p9 = pnand %p4581_p8, %p4575_p3 }
0x15bf   : > { %v3625_v59 = vpop.xlane.xlu0 %3624 }
0x15c0   : > { %v3626_v42 = vmul.f32 0.015625, %v3625_v59 }
0x15c2   : > { %v3627_v43 = vadd.f32 1e-12, %v3626_v42 }
0x15c4   : > { %4542 = vrsqrt.f32 %v3627_v43 }
0x15ce   : > { %v4543_v35 = vpop.eup %4542 }
0x15cf   : > { %v3629_v45 = vmul.f32 %v4543_v35, %v3621_v40 }
0x15d1   : > { %v3636_v47 = vmul.f32 %v4007_v44, %v3629_v45 }
0x15d3   : > { %v3643_v48 = vadd.f32 %v4008_v46, %v3636_v47 }
0x15d5   : > { %3644 = vst.msk [vmem:[%s917_s13] sm:$0xff] %vm1027_vm0, %v3643_v48 }
0x15d6   : > { %4585 = shalt.err (!%p4582_p9)
}
0x15d7   : > { %s4586_s0 = scalar_lea.hbm %s5377_s23, 128  ;;  %s4590_s22 = scalar_lea.hbm %s4832_s4, 256 }
0x15d8   : > { %p4587_p10 = scmp.ne.s32.totalorder %s5377_s23, %s4586_s0  ;;  %p4591_p0 = scmp.lt.u32.totalorder %s5377_s23, %s4832_s4 }
0x15d9   : > { %p4592_p13 = scmp.lt.u32.totalorder %s4590_s22, %s4586_s0  ;;  %p4594_p2 = scmp.lt.u32.totalorder %s4586_s0, %s5377_s23 }
0x15da   : > { %p4588_p11 = pnand %p4587_p10, %p4872_p5 }
0x15db   : > { %p4593_p1 = por %p4592_p13, %p4591_p0 }
0x15dc   : > { %p4589_p12 = pneg %p4588_p11 }
0x15dd   : > { %p4595_p4 = por %p4594_p2, %p4593_p1 }
0x15df   : > { %p4596_p3 = pnand %p4595_p4, %p4589_p12 }
0x15e1   : > { %4599 = shalt.err (!%p4596_p3)
}
0x15e2   : > { %4275 = dma.vmem_to_hbm [thread:$0]  (%p4872_p5), %s5379_s14, 128, %s5377_s23, %s3651_s5  }
0x15e3 PF: > { %p4285_p7 = scmp.ge.s32.totalorder %s4638_s15, 2  ;;  %s3689_s2 = sand.u32 1, %s4626_s7  }
0x15e4   : > { %s3690_s13 = scalar_lea.sflag [#allocation3], %s3689_s2 }
0x15e5   : > { %p4279_p8 = pnand %p4285_p7, %p4876_p6 }
0x15e7   : > { %4617 = dma.done.wait (!%p4279_p8), %s3690_s13, 128  }
0x15e8   : > { %4619 = vsyncadd (!%p4279_p8), %s3690_s13, 4294967168  ;;  %s3699_s8 = scalar_lea.sflag [#allocation5], %s3689_s2 }
0x15e9   : > { %4621 = dma.done.wait (!%p4279_p8), %s3699_s8, 128  }
0x15ea   : > { %4623 = vsyncadd (!%p4279_p8), %s3699_s8, 4294967168  ;;  %p73_p5 = scmp.ge.s32.totalorder %s4859_s18, 4   ;;  %s5477_s7 = smov %s4630_s10 }
0x15eb   : > { %s5478_s10 = smov %s4634_s11  ;;  %s5479_s11 = smov %s4870_s26 }
0x15ec   : > { %s5480_s15 = smov %s4859_s18  ;;  %75 = sbr.rel (!%p73_p5) target bundleno = 60 (0x3c), region = 216 }
0x15f3   :  { %3704 = vsyncpa [#allocation3], 1 }
0x15f4   :  { %3706 = vsyncpa [#allocation3 + $0x1], 1 }
0x15f5   :  { %3707 = vsyncpa [#allocation5], 1 }
0x15f6   :  { %3709 = vsyncpa [#allocation5 + $0x1], 1 }

</bundles_post_ra>
